<compile_context>
chip_gen: v5e
topology: v5e:2x2
jax: 0.10.0
libtpu: 0.0.40
codegen_flags: <defaults>
</compile_context>

<pallas_src>
import numpy as np

import jax
import jax.numpy as jnp
from jax.experimental import pallas as pl
from jax.experimental.pallas import tpu as pltpu


PYRAMIDS = (1, 2, 3, 6)


# ---------------------------------------------------------------------------
# Host-side construction of the tiny separable operators (trace-time numpy).
# ---------------------------------------------------------------------------
def _adaptive_pool_matrix(bin_size, in_size):
    """(bin_size, in_size): row i averages input[start_i:end_i] (PyTorch rule)."""
    m = np.zeros((bin_size, in_size), np.float32)
    for i in range(bin_size):
        start = (i * in_size) // bin_size
        end = -(-((i + 1) * in_size) // bin_size)  # ceil
        m[i, start:end] = 1.0 / float(end - start)
    return m


def _bilinear_matrix(out_size, in_size):
    """(out_size, in_size): F.interpolate(mode='bilinear', align_corners=True)."""
    m = np.zeros((out_size, in_size), np.float32)
    if in_size == 1 or out_size == 1:
        m[:, 0] = 1.0
        return m
    scale = (in_size - 1) / (out_size - 1)
    for o in range(out_size):
        src = o * scale
        i0 = min(int(np.floor(src)), in_size - 1)
        i1 = min(i0 + 1, in_size - 1)
        frac = src - i0
        m[o, i0] += 1.0 - frac
        m[o, i1] += frac
    return m


def _build_ppm_matrices(H, W, pyramids):
    K = int(sum(pyramids))
    pwt = np.zeros((W, K), np.float32)   # pool over W, pre-transposed
    ph = np.zeros((K, H), np.float32)    # pool over H (all levels stacked)
    ah = np.zeros((H, K), np.float32)    # upsample over H
    bwt = np.zeros((K, W), np.float32)   # upsample over W, pre-transposed
    mask = np.zeros((K, K), np.float32)  # same-level (row-bin, col-bin) selector
    off = 0
    for b in pyramids:
        ph[off:off + b, :] = _adaptive_pool_matrix(b, H)
        pwt[:, off:off + b] = _adaptive_pool_matrix(b, W).T
        ah[:, off:off + b] = _bilinear_matrix(H, b)
        bwt[off:off + b, :] = _bilinear_matrix(W, b).T
        mask[off:off + b, off:off + b] = 1.0
        off += b
    return (jnp.asarray(pwt), jnp.asarray(ph), jnp.asarray(ah),
            jnp.asarray(bwt), jnp.asarray(mask))


# ---------------------------------------------------------------------------
# Fused PPM kernel: one grid step processes a block of TB channel maps.
# ---------------------------------------------------------------------------
def _ppm_kernel(x_ref, pwt_ref, ph_ref, ah_ref, bwt_ref, mask_ref, o_ref):
    # x_ref / o_ref : (TB, H, W) block of channel maps (native dtype).
    # Resident f32 constants:
    #   pwt (W,K)  ph (K,H)  ah (H,K)  bwt (K,W)  mask (K,K)
    TB, H, W = x_ref.shape
    K = mask_ref.shape[0]
    f32 = jnp.float32
    hi = jax.lax.Precision.HIGHEST

    xf = x_ref[...].astype(f32)
    pwt = pwt_ref[...]
    ph = ph_ref[...]
    ah = ah_ref[...]
    bwt = bwt_ref[...]
    mask = mask_ref[...]

    flat_ok = (H % 8 == 0)   # (TB,H,*) <-> (TB*H,*) reshapes are layout-free

    # ---- adaptive average pool over W: (TB,H,W) -> (TB,H,K) ---------------
    if flat_ok:
        y = jnp.dot(xf.reshape(TB * H, W), pwt,
                    preferred_element_type=f32,
                    precision=hi).reshape(TB, H, K)
    else:
        pwt_b = jnp.broadcast_to(pwt[None], (TB, W, K))
        y = jnp.einsum('bhw,bwk->bhk', xf, pwt_b,
                       preferred_element_type=f32, precision=hi)

    # ---- adaptive average pool over H (tiny, batched over the block) ------
    ph_b = jnp.broadcast_to(ph[None], (TB, K, H))
    pooled = jnp.einsum('bkh,bhj->bkj', ph_b, y,
                        preferred_element_type=f32, precision=hi)  # (TB,K,K)
    pooled = pooled * jnp.broadcast_to(mask[None], pooled.shape)

    # ---- bilinear upsample over H (tiny, batched) --------------------------
    ah_b = jnp.broadcast_to(ah[None], (TB, H, K))
    z = jnp.einsum('bhk,bkj->bhj', ah_b, pooled,
                   preferred_element_type=f32, precision=hi)       # (TB,H,K)

    # ---- bilinear upsample over W: (TB,H,K) -> (TB,H,W), summed over levels
    if flat_ok:
        up = jnp.dot(z.reshape(TB * H, K), bwt,
                     preferred_element_type=f32,
                     precision=hi).reshape(TB, H, W)
    else:
        bwt_b = jnp.broadcast_to(bwt[None], (TB, K, W))
        up = jnp.einsum('bhk,bkw->bhw', z, bwt_b,
                        preferred_element_type=f32, precision=hi)

    o_ref[...] = (xf + up).astype(o_ref.dtype)


# ---------------------------------------------------------------------------
# Wrapper: NCHW in / NCHW out, matching the PyTorch module.
# ---------------------------------------------------------------------------
def _largest_divisor_leq(n, cap):
    cap = max(1, min(int(cap), n))
    for d in range(cap, 0, -1):
        if n % d == 0:
            return d
    return 1


def pyramid_pooling_module(x, pyramids=PYRAMIDS, target_block_bytes=2 << 20):
    N, C, H, W = x.shape
    NC = N * C
    itemsize = jnp.dtype(x.dtype).itemsize
    map_bytes = H * W * itemsize

    # Block of maps sized for ~target_block_bytes of I/O per grid step; TB is
    # a divisor of N*C so there is no padding / tail slicing (extra HBM passes).
    tb_cap = max(1, target_block_bytes // map_bytes)
    if NC >= 64 and NC // min(tb_cap, NC) < 8:
        tb_cap = max(8, NC // 8)   # keep >= 8 grid steps (megacore + pipelining)
    TB = _largest_divisor_leq(NC, tb_cap)
    n_blocks = NC // TB

    pwt, ph, ah, bwt, mask = _build_ppm_matrices(H, W, pyramids)
    K = int(mask.shape[0])

    # Explicit VMEM budget: double-buffered in/out blocks + f32 intermediates
    # + resident constants; clamped to stay comfortable on v7x (64 MiB phys).
    block_bytes = TB * map_bytes
    f32_map = TB * H * W * 4
    scratch_est = 3 * f32_map + TB * 4 * (6 * H * K + 2 * W * K + 2 * K * K)
    const_bytes = 2 * 4 * (W * K + K * H + H * K + K * W + K * K)
    vmem_limit = 4 * block_bytes + scratch_est + const_bytes + (2 << 20)
    vmem_limit = int(min(max(vmem_limit, 16 << 20), 48 << 20))

    x_maps = x.reshape(NC, H, W)          # free contiguous reshape, native dtype

    out = pl.pallas_call(
        _ppm_kernel,
        out_shape=jax.ShapeDtypeStruct((NC, H, W), x.dtype),
        grid=(n_blocks,),
        in_specs=[
            pl.BlockSpec((TB, H, W), lambda i: (i, 0, 0)),   # maps: pipelined
            pl.BlockSpec((W, K), lambda i: (0, 0)),          # resident constants
            pl.BlockSpec((K, H), lambda i: (0, 0)),
            pl.BlockSpec((H, K), lambda i: (0, 0)),
            pl.BlockSpec((K, W), lambda i: (0, 0)),
            pl.BlockSpec((K, K), lambda i: (0, 0)),
        ],
        out_specs=pl.BlockSpec((TB, H, W), lambda i: (i, 0, 0)),
        compiler_params=pltpu.CompilerParams(
            dimension_semantics=("parallel",),
            vmem_limit_bytes=vmem_limit),
    )(x_maps, pwt, ph, ah, bwt, mask)

    return out.reshape(N, C, H, W)


# ---------------------------------------------------------------------------
# Independent numpy reference (direct adaptive pool + bilinear interpolation).
# ---------------------------------------------------------------------------
def _ppm_reference(x, pyramids=PYRAMIDS):
    x = np.asarray(x, np.float32)
    N, C, H, W = x.shape
    feat = x.copy()
    for b in pyramids:
        pooled = np.zeros((N, C, b, b), np.float32)
        for i in range(b):
            hs, he = (i * H) // b, -(-((i + 1) * H) // b)
            for j in range(b):
                ws, we = (j * W) // b, -(-((j + 1) * W) // b)
                pooled[:, :, i, j] = x[:, :, hs:he, ws:we].mean(axis=(2, 3))
        if b == 1:
            up = np.broadcast_to(pooled, (N, C, H, W))
        else:
            hsrc = np.arange(H) * (b - 1) / (H - 1)
            wsrc = np.arange(W) * (b - 1) / (W - 1)
            h0 = np.clip(np.floor(hsrc).astype(int), 0, b - 1)
            h1 = np.minimum(h0 + 1, b - 1)
            w0 = np.clip(np.floor(wsrc).astype(int), 0, b - 1)
            w1 = np.minimum(w0 + 1, b - 1)
            fh = (hsrc - h0)[None, None, :, None]
            fw = (wsrc - w0)[None, None, None, :]
            p00 = pooled[:, :, h0][:, :, :, w0]
            p01 = pooled[:, :, h0][:, :, :, w1]
            p10 = pooled[:, :, h1][:, :, :, w0]
            p11 = pooled[:, :, h1][:, :, :, w1]
            up = (p00 * (1 - fh) * (1 - fw) + p01 * (1 - fh) * fw
                  + p10 * fh * (1 - fw) + p11 * fh * fw)
        feat = feat + up
    return feat


if __name__ == "__main__":
    key = jax.random.PRNGKey(0)
    N, C, H, W = 2, 4, 16, 16
    x = jax.random.normal(key, (N, C, H, W), jnp.float32)

    out = jax.jit(pyramid_pooling_module)(x)
    jax.block_until_ready(out)

    assert out.shape == (N, C, H, W)
    ref = _ppm_reference(np.asarray(x))
    np.testing.assert_allclose(np.asarray(out), ref, rtol=2e-2, atol=2e-2)
    print("KERNEL_OK")
</pallas_src>

<mosaic_0001>
module attributes {stable_mosaic.version = 11 : i64} {
  func.func @_ppm_kernel(%arg0: i32, %arg1: memref<8x16x16xf32, #tpu.memory_space<vmem>>, %arg2: memref<16x12xf32, #tpu.memory_space<vmem>>, %arg3: memref<12x16xf32, #tpu.memory_space<vmem>>, %arg4: memref<16x12xf32, #tpu.memory_space<vmem>>, %arg5: memref<12x16xf32, #tpu.memory_space<vmem>>, %arg6: memref<12x12xf32, #tpu.memory_space<vmem>>, %arg7: memref<8x16x16xf32, #tpu.memory_space<vmem>>) attributes {dimension_semantics = [#tpu.dimension_semantics<parallel>], iteration_bounds = array<i64: 1>, scalar_prefetch = 0 : i64, scratch_operands = 0 : i64, tpu.core_type = #tpu.core_type<tc>, window_params = [{transform_indices = @transform_0, window_bounds = array<i64: 8, 16, 16>}, {pipeline_mode = #tpu.pipeline_mode<synchronous>, transform_indices = @transform_1, window_bounds = array<i64: 16, 12>}, {pipeline_mode = #tpu.pipeline_mode<synchronous>, transform_indices = @transform_2, window_bounds = array<i64: 12, 16>}, {pipeline_mode = #tpu.pipeline_mode<synchronous>, transform_indices = @transform_3, window_bounds = array<i64: 16, 12>}, {pipeline_mode = #tpu.pipeline_mode<synchronous>, transform_indices = @transform_4, window_bounds = array<i64: 12, 16>}, {pipeline_mode = #tpu.pipeline_mode<synchronous>, transform_indices = @transform_5, window_bounds = array<i64: 12, 12>}, {transform_indices = @transform_6, window_bounds = array<i64: 8, 16, 16>}]} {
    %c0 = arith.constant 0 : index
    %c0_0 = arith.constant 0 : index
    %c0_1 = arith.constant 0 : index
    %0 = vector.load %arg1[%c0, %c0_0, %c0_1] : memref<8x16x16xf32, #tpu.memory_space<vmem>>, vector<8x16x16xf32>
    %c0_2 = arith.constant 0 : index
    %c0_3 = arith.constant 0 : index
    %1 = vector.load %arg2[%c0_2, %c0_3] : memref<16x12xf32, #tpu.memory_space<vmem>>, vector<16x12xf32>
    %c0_4 = arith.constant 0 : index
    %c0_5 = arith.constant 0 : index
    %2 = vector.load %arg3[%c0_4, %c0_5] : memref<12x16xf32, #tpu.memory_space<vmem>>, vector<12x16xf32>
    %c0_6 = arith.constant 0 : index
    %c0_7 = arith.constant 0 : index
    %3 = vector.load %arg4[%c0_6, %c0_7] : memref<16x12xf32, #tpu.memory_space<vmem>>, vector<16x12xf32>
    %c0_8 = arith.constant 0 : index
    %c0_9 = arith.constant 0 : index
    %4 = vector.load %arg5[%c0_8, %c0_9] : memref<12x16xf32, #tpu.memory_space<vmem>>, vector<12x16xf32>
    %c0_10 = arith.constant 0 : index
    %c0_11 = arith.constant 0 : index
    %5 = vector.load %arg6[%c0_10, %c0_11] : memref<12x12xf32, #tpu.memory_space<vmem>>, vector<12x12xf32>
    %6 = vector.shape_cast %0 : vector<8x16x16xf32> to vector<128x16xf32>
    %cst = arith.constant dense<0.000000e+00> : vector<128x12xf32>
    %7 = tpu.matmul %6, %1, %cst {dimension_numbers = #tpu.dot_dimension_numbers<[1], [0], [0], [1], [0, 0, 1, 1], [], []>, precision = #tpu.contract_precision<fp32>} : vector<128x16xf32>, vector<16x12xf32>, vector<128x12xf32> -> vector<128x12xf32>
    %8 = vector.shape_cast %7 : vector<128x12xf32> to vector<8x16x12xf32>
    %9 = vector.shape_cast %2 : vector<12x16xf32> to vector<1x12x16xf32>
    %10 = vector.shape_cast %9 : vector<1x12x16xf32> to vector<1x12x16xf32>
    %11 = vector.broadcast %10 : vector<1x12x16xf32> to vector<8x12x16xf32>
    "tpu.trace_start"() <{level = 10 : i32, message = "bkh,bhj->bkj"}> : () -> ()
    %cst_12 = arith.constant dense<0.000000e+00> : vector<8x12x12xf32>
    %12 = tpu.matmul %11, %8, %cst_12 {dimension_numbers = #tpu.dot_dimension_numbers<[2], [1], [1], [2], [0, 0, 0, 1, 1, 2], [0], [0]>, precision = #tpu.contract_precision<fp32>} : vector<8x12x16xf32>, vector<8x16x12xf32>, vector<8x12x12xf32> -> vector<8x12x12xf32>
    "tpu.trace_stop"() : () -> ()
    %13 = vector.shape_cast %5 : vector<12x12xf32> to vector<1x12x12xf32>
    %14 = vector.shape_cast %13 : vector<1x12x12xf32> to vector<1x12x12xf32>
    %15 = vector.broadcast %14 : vector<1x12x12xf32> to vector<8x12x12xf32>
    %16 = arith.mulf %12, %15 : vector<8x12x12xf32>
    %17 = vector.shape_cast %3 : vector<16x12xf32> to vector<1x16x12xf32>
    %18 = vector.shape_cast %17 : vector<1x16x12xf32> to vector<1x16x12xf32>
    %19 = vector.broadcast %18 : vector<1x16x12xf32> to vector<8x16x12xf32>
    "tpu.trace_start"() <{level = 10 : i32, message = "bhk,bkj->bhj"}> : () -> ()
    %cst_13 = arith.constant dense<0.000000e+00> : vector<8x16x12xf32>
    %20 = tpu.matmul %19, %16, %cst_13 {dimension_numbers = #tpu.dot_dimension_numbers<[2], [1], [1], [2], [0, 0, 0, 1, 1, 2], [0], [0]>, precision = #tpu.contract_precision<fp32>} : vector<8x16x12xf32>, vector<8x12x12xf32>, vector<8x16x12xf32> -> vector<8x16x12xf32>
    "tpu.trace_stop"() : () -> ()
    %21 = vector.shape_cast %20 : vector<8x16x12xf32> to vector<128x12xf32>
    %cst_14 = arith.constant dense<0.000000e+00> : vector<128x16xf32>
    %22 = tpu.matmul %21, %4, %cst_14 {dimension_numbers = #tpu.dot_dimension_numbers<[1], [0], [0], [1], [0, 0, 1, 1], [], []>, precision = #tpu.contract_precision<fp32>} : vector<128x12xf32>, vector<12x16xf32>, vector<128x16xf32> -> vector<128x16xf32>
    %23 = vector.shape_cast %22 : vector<128x16xf32> to vector<8x16x16xf32>
    %24 = arith.addf %0, %23 : vector<8x16x16xf32>
    %c0_15 = arith.constant 0 : index
    %c0_16 = arith.constant 0 : index
    %c0_17 = arith.constant 0 : index
    %25 = vector.load %arg7[%c0_15, %c0_16, %c0_17] : memref<8x16x16xf32, #tpu.memory_space<vmem>>, vector<8x16x16xf32>
    tpu.vector_store %arg7[%c0_15, %c0_16, %c0_17], %24 {strides = array<i32>} : memref<8x16x16xf32, #tpu.memory_space<vmem>>, vector<8x16x16xf32>,
    return
  }
  func.func @transform_0(%arg0: i32) -> (i32, i32, i32) {
    %c0_i32 = arith.constant 0 : i32
    %c0_i32_0 = arith.constant 0 : i32
    %c0_i32_1 = arith.constant 0 : i32
    return %arg0, %c0_i32, %c0_i32_0 : i32, i32, i32
  }
  func.func @transform_1(%arg0: i32) -> (i32, i32) {
    %c0_i32 = arith.constant 0 : i32
    %c0_i32_0 = arith.constant 0 : i32
    %c0_i32_1 = arith.constant 0 : i32
    return %c0_i32, %c0_i32_0 : i32, i32
  }
  func.func @transform_2(%arg0: i32) -> (i32, i32) {
    %c0_i32 = arith.constant 0 : i32
    %c0_i32_0 = arith.constant 0 : i32
    %c0_i32_1 = arith.constant 0 : i32
    return %c0_i32, %c0_i32_0 : i32, i32
  }
  func.func @transform_3(%arg0: i32) -> (i32, i32) {
    %c0_i32 = arith.constant 0 : i32
    %c0_i32_0 = arith.constant 0 : i32
    %c0_i32_1 = arith.constant 0 : i32
    return %c0_i32, %c0_i32_0 : i32, i32
  }
  func.func @transform_4(%arg0: i32) -> (i32, i32) {
    %c0_i32 = arith.constant 0 : i32
    %c0_i32_0 = arith.constant 0 : i32
    %c0_i32_1 = arith.constant 0 : i32
    return %c0_i32, %c0_i32_0 : i32, i32
  }
  func.func @transform_5(%arg0: i32) -> (i32, i32) {
    %c0_i32 = arith.constant 0 : i32
    %c0_i32_0 = arith.constant 0 : i32
    %c0_i32_1 = arith.constant 0 : i32
    return %c0_i32, %c0_i32_0 : i32, i32
  }
  func.func @transform_6(%arg0: i32) -> (i32, i32, i32) {
    %c0_i32 = arith.constant 0 : i32
    %c0_i32_0 = arith.constant 0 : i32
    %c0_i32_1 = arith.constant 0 : i32
    return %arg0, %c0_i32, %c0_i32_0 : i32, i32, i32
  }
}

</mosaic_0001>

<bundles_post_ra>
// kernel: pyramid_pooling_module.1
= control target key start
LH: loop header
LB: loop body
LE: loop exit
PB: predicated region body
PF: predicated region fallthrough
CT: control target
= control target key end

     0   :  { %11 = vsyncpa [#allocation3], 0  ;;  %s6193_s0 = inlined_call_operand.hbm [shape: f32[8,16,16], index: 0, kind: input, shape index: {}]   ;;  %s6194_s1 = inlined_call_operand.hbm [shape: f32[16,12], index: 1, kind: input, shape index: {}]   ;;  %s6195_s2 = inlined_call_operand.hbm [shape: f32[12,16], index: 2, kind: input, shape index: {}]   ;;  %s6196_s3 = inlined_call_operand.hbm [shape: f32[16,12], index: 3, kind: input, shape index: {}]   ;;  %s6197_s4 = inlined_call_operand.hbm [shape: f32[12,16], index: 4, kind: input, shape index: {}]   ;;  %s6198_s5 = inlined_call_operand.hbm [shape: f32[12,12], index: 5, kind: input, shape index: {}]   ;;  %s6199_s6 = inlined_call_operand.hbm [shape: f32[8,16,16], index: 6, kind: output, shape index: {}]  }
   0x1   :  { %12 = vsyncpa [#allocation6], 0 }
   0x2   :  { %13 = vsyncpa [#allocation9], 0 }
   0x3   :  { %14 = vsyncpa [#allocation12], 0 }
   0x4   :  { %15 = vsyncpa [#allocation4], 0  ;;  %s33_s23 = sshll.u32 %s6194_s1, 4  ;;  %s4847_s24 = smov [#allocation5]   ;;  %s34_s23 = int_to_ptr.hbm [resolvable:$true] %s33_s23 }
   0x5   :  { %s35_s25 = sshll.u32 %s4847_s24, 4  ;;  %s59_s28 = sshll.u32 %s6196_s3, 4  ;;  %s36_s25 = int_to_ptr.vmem [resolvable:$true] %s35_s25  ;;  %s60_s28 = int_to_ptr.hbm [resolvable:$true] %s59_s28 }
   0x6   :  { %s4848_s29 = smov 128   ;;  %s4849_s30 = smov 8  }
   0x7   :  { %41 = dma.hbm_to_vmem [thread:$0]  %s34_s23, 256, %s36_s25, [#allocation6], %s4848_s29, %s4848_s29, %s4849_s30  }
   0x8   :  { %s4850_s7 = smov [#allocation8]   ;;  %s20_s1 = sshll.u32 %s6193_s0, 4  ;;  %s21_s1 = int_to_ptr.hbm [resolvable:$true] %s20_s1 }
   0x9   :  { %s61_s8 = sshll.u32 %s4850_s7, 4  ;;  %s46_s12 = sshll.u32 %s6195_s2, 4  ;;  %s62_s8 = int_to_ptr.vmem [resolvable:$true] %s61_s8  ;;  %s47_s12 = int_to_ptr.hbm [resolvable:$true] %s46_s12 }
   0xa   :  { %67 = dma.hbm_to_vmem [thread:$0]  %s60_s28, 256, %s62_s8, [#allocation9], %s4848_s29, %s4848_s29, %s4849_s30  }
   0xb   :  { %s4851_s13 = smov [#allocation2]   ;;  %s4852_s15 = smov [#allocation7]  }
   0xc   :  { %s22_s14 = sshll.u32 %s4851_s13, 4  ;;  %s48_s0 = sshll.u32 %s4852_s15, 4  ;;  %s23_s14 = int_to_ptr.vmem [resolvable:$true] %s22_s14  ;;  %s49_s0 = int_to_ptr.vmem [resolvable:$true] %s48_s0 }
   0xd   :  { %28 = dma.hbm_to_vmem [thread:$0]  %s21_s1, 2048, %s23_s14, [#allocation3], %s4848_s29, %s4848_s29, %s4849_s30  }
   0xe   :  { %s72_s18 = sshll.u32 %s6197_s4, 4  ;;  %s85_s20 = sshll.u32 %s6198_s5, 4  ;;  %s73_s18 = int_to_ptr.hbm [resolvable:$true] %s72_s18  ;;  %s86_s20 = int_to_ptr.hbm [resolvable:$true] %s85_s20 }
   0xf   :  { %54 = dma.hbm_to_vmem [thread:$0]  %s47_s12, 256, %s49_s0, [#allocation6], %s4848_s29, %s4848_s29, %s4849_s30  }
  0x10   :  { %s4853_s21 = smov [#allocation10]   ;;  %s4854_s23 = smov [#allocation11]  }
  0x11   :  { %s74_s22 = sshll.u32 %s4853_s21, 4  ;;  %s87_s4 = sshll.u32 %s4854_s23, 4  ;;  %s75_s22 = int_to_ptr.vmem [resolvable:$true] %s74_s22  ;;  %s88_s4 = int_to_ptr.vmem [resolvable:$true] %s87_s4 }
  0x12   :  { %80 = dma.hbm_to_vmem [thread:$0]  %s73_s18, 256, %s75_s22, [#allocation9], %s4848_s29, %s4848_s29, %s4849_s30  }
  0x13   :  { %93 = dma.hbm_to_vmem [thread:$0]  %s86_s20, 256, %s88_s4, [#allocation12], %s4848_s29, %s4848_s29, %s4849_s30  }
  0x14   :  { %4837 = dma.done.wait [#allocation3], 2048  }
  0x15   :  { %4838 = vsyncadd [#allocation3], 4294965248 }
  0x16   :  { %4839 = dma.done.wait [#allocation6], 512  }
  0x17   :  { %4840 = vsyncadd [#allocation6], 4294966784 }
  0x18   :  { %4841 = dma.done.wait [#allocation9], 512  }
  0x19   :  { %4842 = vsyncadd [#allocation9], 4294966784 }
  0x1a   :  { %4843 = dma.done.wait [#allocation12], 256  }
  0x1b   :  { %4844 = vsyncadd [#allocation12], 4294967040  ;;  %vm144_vm0 = vcmask 130048   ;;  %v135_v0 = vld [vmem:[#allocation5 + $0x8] sm:$0xff]  ;;  %v134_v1 = vld [vmem:[#allocation5] sm:$0xff]  ;;  %vm2366_vm1 = vcmask 1043456  }
  0x1c   :  { %v126_v2 = vld [vmem:[#allocation2 + $0x40] sm:$0xff]  ;;  %v4927_v3 = vand.u32 4294901760, %v135_v0  ;;  %v4929_v4 = vand.u32 4294901760, %v134_v1  ;;  %v127_v6 = vld [vmem:[#allocation2 + $0x48] sm:$0xff]  ;;  %v128_v8 = vld [vmem:[#allocation2 + $0x50] sm:$0xff]  ;;  %vm2359_vm2 = vcmask 97280  }
  0x1d   :  { %v170_v5 = vsel %vm144_vm0, %v126_v2, 0  ;;  %v118_v7 = vld [vmem:[#allocation2] sm:$0xff]  ;;  %v173_v10 = vsel %vm144_vm0, %v127_v6, 0  ;;  %v119_v12 = vld [vmem:[#allocation2 + $0x8] sm:$0xff]  ;;  %v176_v18 = vsel %vm144_vm0, %v128_v8, 0  ;;  %v120_v33 = vld [vmem:[#allocation2 + $0x10] sm:$0xff] }
  0x1e   :  { %v4932_v9 = vand.u32 4294901760, %v170_v5  ;;  %v146_v11 = vsel %vm144_vm0, %v118_v7, 0  ;;  %4640 = vmatpush.msra.mxu2 %v4927_v3  ;;  %v355_v13 = vsub.f32 %v135_v0, %v4927_v3  ;;  %v361_v14 = vsub.f32 %v134_v1, %v4929_v4  ;;  %208 = vmatpush.msra.mxu0 %v4927_v3  ;;  %v129_v39 = vld [vmem:[#allocation2 + $0x58] sm:$0xff]  ;;  %v130_v55 = vld [vmem:[#allocation2 + $0x60] sm:$0xff]  ;;  %s4855_s5 = smov [#allocation13]   ;;  %s4624_s27 = sshll.u32 %s6199_s6, 4  ;;  %s4625_s27 = int_to_ptr.hbm [resolvable:$true] %s4624_s27 }
  0x1f   :  { %v4940_v15 = vand.u32 4294901760, %v173_v10  ;;  %v4942_v16 = vand.u32 4294901760, %v146_v11  ;;  %v149_v19 = vsel %vm144_vm0, %v119_v12, 0  ;;  %v4965_v31 = vand.u32 4294901760, %v176_v18  ;;  %v121_v45 = vld [vmem:[#allocation2 + $0x18] sm:$0xff]  ;;  %v122_v59 = vld [vmem:[#allocation2 + $0x20] sm:$0xff] }
  0x20   :  { %v4945_v17 = vsub.f32 %v170_v5, %v4932_v9  ;;  %4641 = vmatpush.msra.mxu2 %v4929_v4  ;;  %v356_v20 = vand.u32 4294901760, %v355_v13  ;;  %v362_v21 = vand.u32 4294901760, %v361_v14  ;;  %210 = vmatpush.msra.mxu0 %v4929_v4  ;;  %v4958_v25 = vand.u32 4294901760, %v149_v19  ;;  %v131_v5 = vld [vmem:[#allocation2 + $0x68] sm:$0xff]  ;;  %s4622_s24 = sshll.u32 %s4855_s5, 4  ;;  %s4623_s24 = int_to_ptr.vmem [resolvable:$true] %s4622_s24 }
  0x21   :  { %v4951_v22 = vsub.f32 %v173_v10, %v4940_v15  ;;  %v4955_v23 = vsub.f32 %v146_v11, %v4942_v16  ;;  %v152_v41 = vsel %vm144_vm0, %v120_v33, 0  ;;  %v4979_v43 = vsub.f32 %v176_v18, %v4965_v31  ;;  %v123_v10 = vld [vmem:[#allocation2 + $0x28] sm:$0xff] }
  0x22   :  { %v277_v24 = vand.u32 4294901760, %v4945_v17  ;;  %447 = vmatpush.msrb.mxu2 %v355_v13  ;;  %v357_v26 = vsub.f32 %v355_v13, %v356_v20  ;;  %v363_v27 = vsub.f32 %v361_v14, %v362_v21  ;;  %664 = vmatpush.msrb.mxu0 %v356_v20  ;;  %v4968_v32 = vsub.f32 %v149_v19, %v4958_v25 }
  0x23   :  { %v213_v28 = vand.u32 4294901760, %v4955_v23  ;;  %v285_v30 = vand.u32 4294901760, %v4951_v22  ;;  %v4981_v44 = vand.u32 4294901760, %v152_v41  ;;  %v179_v46 = vsel %vm144_vm0, %v129_v39, 0 }
  0x24   :  { %v278_v29 = vsub.f32 %v4945_v17, %v277_v24  ;;  %450 = vmatpush.msrb.mxu2 %v361_v14  ;;  %v358_v34 = vand.u32 4294901760, %v357_v26  ;;  %v364_v35 = vand.u32 4294901760, %v363_v27  ;;  %668 = vmatpush.msrb.mxu0 %v362_v21  ;;  %v221_v38 = vand.u32 4294901760, %v4968_v32  ;;  %v132_v27 = vld [vmem:[#allocation2 + $0x70] sm:$0xff] }
  0x25   :  { %v214_v36 = vsub.f32 %v4955_v23, %v213_v28  ;;  %v286_v42 = vsub.f32 %v4951_v22, %v285_v30  ;;  %v4989_v48 = vsub.f32 %v152_v41, %v4981_v44  ;;  %v155_v49 = vsel %vm144_vm0, %v121_v45, 0 }
  0x26   :  { %v279_v37 = vand.u32 4294901760, %v278_v29  ;;  %4642 = vmatpush.msra.mxu3 %v358_v34  ;;  %359 = vmatpush.msra.mxu1 %v358_v34  ;;  %v222_v47 = vsub.f32 %v4968_v32, %v221_v38  ;;  %v293_v51 = vand.u32 4294901760, %v4979_v43  ;;  %v4995_v52 = vand.u32 4294901760, %v179_v46 }
  0x27   :  { %v215_v40 = vand.u32 4294901760, %v214_v36  ;;  %v287_v50 = vand.u32 4294901760, %v286_v42  ;;  %v229_v54 = vand.u32 4294901760, %v4989_v48  ;;  %v5000_v56 = vand.u32 4294901760, %v155_v49 }
  0x28   :  { %280 = vmatmul.f32.vlgmr.msra.gmra.mxu2 %v279_v37  ;;  %4643 = vmatpush.msra.mxu3 %v364_v35  ;;  %v223_v53 = vand.u32 4294901760, %v222_v47  ;;  %v294_v57 = vsub.f32 %v4979_v43, %v293_v51  ;;  %v5007_v58 = vsub.f32 %v179_v46, %v4995_v52  ;;  %v182_v60 = vsel %vm144_vm0, %v130_v55, 0 }
  0x29   :  { %365 = vmatpush.msra.mxu1 %v364_v35  ;;  %399 = vmatmul.f32.vlgmr.msra.gmra.mxu3 %v4932_v9  ;;  %v230_v61 = vsub.f32 %v4989_v48, %v229_v54  ;;  %v5015_v62 = vsub.f32 %v155_v49, %v5000_v56  ;;  %v158_v63 = vsel %vm144_vm0, %v122_v59, 0  ;;  %v5020_v2 = vand.u32 4294901760, %v182_v60  ;;  %v124_v35 = vld [vmem:[#allocation2 + $0x30] sm:$0xff]  ;;  %v133_v49 = vld [vmem:[#allocation2 + $0x78] sm:$0xff] }
  0x2a   :  { %216 = vmatmul.f32.vlgmr.msra.gmra.mxu0 %v215_v40  ;;  %367 = vmatmul.f32.vlgmr.msra.gmra.mxu1 %v4942_v16  ;;  %v295_v0 = vand.u32 4294901760, %v294_v57  ;;  %v301_v1 = vand.u32 4294901760, %v5007_v58  ;;  %v5023_v6 = vand.u32 4294901760, %v158_v63  ;;  %v185_v11 = vsel %vm144_vm0, %v131_v5, 0  ;;  %v125_v57 = vld [vmem:[#allocation2 + $0x38] sm:$0xff] }
  0x2b   :  { %547 = vmatpush.msrb.mxu3 %v4927_v3  ;;  %749 = vmatpush.msrb.mxu1 %v4927_v3  ;;  %v231_v3 = vand.u32 4294901760, %v230_v61  ;;  %v5029_v8 = vsub.f32 %v182_v60, %v5020_v2  ;;  %v161_v14 = vsel %vm144_vm0, %v123_v10, 0  ;;  %v5042_v20 = vand.u32 4294901760, %v185_v11 }
  0x2c   :  { %v302_v7 = vsub.f32 %v5007_v58, %v301_v1  ;;  %v5037_v13 = vsub.f32 %v158_v63, %v5023_v6  ;;  %v5045_v29 = vand.u32 4294901760, %v161_v14  ;;  %v188_v36 = vsel %vm144_vm0, %v132_v27, 0 }
  0x2d   :  { %549 = vmatpush.msrb.mxu3 %v4929_v4  ;;  %751 = vmatpush.msrb.mxu1 %v4929_v4  ;;  %v237_v4 = vand.u32 4294901760, %v5015_v62  ;;  %v309_v19 = vand.u32 4294901760, %v5029_v8  ;;  %v5051_v34 = vsub.f32 %v185_v11, %v5042_v20  ;;  %v164_v40 = vsel %vm144_vm0, %v124_v35, 0 }
  0x2e   :  { %v303_v18 = vand.u32 4294901760, %v302_v7  ;;  %v245_v26 = vand.u32 4294901760, %v5037_v13  ;;  %v5059_v39 = vsub.f32 %v161_v14, %v5045_v29  ;;  %v5064_v45 = vand.u32 4294901760, %v188_v36 }
  0x2f   :  { %v238_v12 = vsub.f32 %v5015_v62, %v237_v4  ;;  %v310_v33 = vsub.f32 %v5029_v8, %v309_v19  ;;  %v317_v42 = vand.u32 4294901760, %v5051_v34  ;;  %v191_v59 = vsel %vm144_vm0, %v133_v49, 0 }
  0x30   :  { %288 = vmatmul.f32.gmra.mxu2 %v287_v50  ;;  %v246_v37 = vsub.f32 %v5037_v13, %v245_v26  ;;  %v253_v47 = vand.u32 4294901760, %v5059_v39  ;;  %v5067_v50 = vand.u32 4294901760, %v164_v40  ;;  %v5073_v55 = vsub.f32 %v188_v36, %v5064_v45 }
  0x31   :  { %403 = vmatmul.f32.gmra.mxu3 %v4940_v15  ;;  %v239_v21 = vand.u32 4294901760, %v238_v12  ;;  %v311_v41 = vand.u32 4294901760, %v310_v33  ;;  %v167_v63 = vsel %vm144_vm0, %v125_v57, 0  ;;  %v5084_v5 = vand.u32 4294901760, %v191_v59 }
  0x32   :  { %224 = vmatmul.f32.gmra.mxu0 %v223_v53  ;;  %371 = vmatmul.f32.gmra.mxu1 %v4958_v25  ;;  %v247_v46 = vand.u32 4294901760, %v246_v37  ;;  %v318_v53 = vsub.f32 %v5051_v34, %v317_v42  ;;  %v254_v60 = vsub.f32 %v5059_v39, %v253_v47  ;;  %v260_v61 = vsub.f32 %v164_v40, %v5067_v50 }
  0x33   :  { %v267_v11 = vand.u32 4294901760, %v167_v63  ;;  %v5090_v14 = vsub.f32 %v191_v59, %v5084_v5 }
  0x34   :  { %v255_v7 = vand.u32 4294901760, %v254_v60  ;;  %v261_v10 = vand.u32 4294901760, %v260_v61  ;;  %v137_v60 = vld [vmem:[#allocation7 + $0x8] sm:$0xf] }
  0x35   :  { %v333_v33 = vand.u32 4294901760, %v5090_v14 }
  0x37   :  { %v334_v37 = vsub.f32 %v5090_v14, %v333_v33 }
  0x38   :  { %296 = vmatmul.f32.gmra.mxu2 %v295_v0  ;;  %v319_v0 = vand.u32 4294901760, %v318_v53 }
  0x39   :  { %407 = vmatmul.f32.gmra.mxu3 %v4965_v31 }
  0x3a   :  { %232 = vmatmul.f32.gmra.mxu0 %v231_v3  ;;  %375 = vmatmul.f32.gmra.mxu1 %v4981_v44  ;;  %v325_v3 = vand.u32 4294901760, %v5073_v55 }
  0x3c   :  { %v326_v12 = vsub.f32 %v5073_v55, %v325_v3 }
  0x3e   :  { %v327_v27 = vand.u32 4294901760, %v326_v12 }
  0x40   :  { %304 = vmatmul.f32.gmra.mxu2 %v303_v18  ;;  %v262_v18 = vsub.f32 %v260_v61, %v261_v10 }
  0x41   :  { %411 = vmatmul.f32.gmra.mxu3 %v4995_v52 }
  0x42   :  { %240 = vmatmul.f32.gmra.mxu0 %v239_v21  ;;  %379 = vmatmul.f32.gmra.mxu1 %v5000_v56  ;;  %v268_v21 = vsub.f32 %v167_v63, %v267_v11  ;;  %v263_v35 = vand.u32 4294901760, %v262_v18 }
  0x44   :  { %v269_v36 = vand.u32 4294901760, %v268_v21 }
  0x46   :  { %v270_v40 = vsub.f32 %v268_v21, %v269_v36 }
  0x48   :  { %312 = vmatmul.f32.gmra.mxu2 %v311_v41  ;;  %v335_v41 = vand.u32 4294901760, %v334_v37 }
  0x49   :  { %415 = vmatmul.f32.gmra.mxu3 %v5020_v2 }
  0x4a   :  { %248 = vmatmul.f32.gmra.mxu0 %v247_v46  ;;  %383 = vmatmul.f32.gmra.mxu1 %v5023_v6  ;;  %v271_v46 = vand.u32 4294901760, %v270_v40 }
  0x50   :  { %320 = vmatmul.f32.gmra.mxu2 %v319_v0 }
  0x51   :  { %419 = vmatmul.f32.gmra.mxu3 %v5042_v20 }
  0x52   :  { %256 = vmatmul.f32.gmra.mxu0 %v255_v7  ;;  %387 = vmatmul.f32.gmra.mxu1 %v5045_v29  ;;  %v821_v7 = vsel %vm144_vm0, %v137_v60, 0 }
  0x53   :  { %v5251_v18 = vand.u32 4294901760, %v821_v7 }
  0x55   :  { %v5256_v40 = vsub.f32 %v821_v7, %v5251_v18 }
  0x58   :  { %328 = vmatmul.f32.gmra.mxu2 %v327_v27 }
  0x59   :  { %423 = vmatmul.f32.gmra.mxu3 %v5064_v45 }
  0x5a   :  { %264 = vmatmul.f32.gmra.mxu0 %v263_v35  ;;  %391 = vmatmul.f32.gmra.mxu1 %v5067_v50 }
  0x60   :  { %336 = vmatmul.f32.gmra.mxu2 %v335_v41 }
  0x61   :  { %427 = vmatmul.f32.gmra.mxu3 %v5084_v5 }
  0x62   :  { %272 = vmatmul.f32.gmra.mxu0 %v271_v46  ;;  %395 = vmatmul.f32.gmra.mxu1 %v267_v11 }
  0x68   :  { %453 = vmatmul.f32.vlgmr.msrb.gmra.mxu2 %v4955_v23 }
  0x69   :  { %553 = vmatmul.f32.vlgmr.msrb.gmra.mxu3 %v213_v28 }
  0x6a   :  { %670 = vmatmul.f32.vlgmr.msrb.gmra.mxu0 %v4942_v16  ;;  %753 = vmatmul.f32.vlgmr.msrb.gmra.mxu1 %v4942_v16 }
  0x70   :  { %458 = vmatmul.f32.gmra.mxu2 %v4968_v32 }
  0x71   :  { %559 = vmatmul.f32.gmra.mxu3 %v221_v38 }
  0x72   :  { %674 = vmatmul.f32.gmra.mxu0 %v4958_v25  ;;  %757 = vmatmul.f32.gmra.mxu1 %v4958_v25 }
  0x78   :  { %463 = vmatmul.f32.gmra.mxu2 %v4989_v48 }
  0x79   :  { %565 = vmatmul.f32.gmra.mxu3 %v229_v54 }
  0x7a   :  { %678 = vmatmul.f32.gmra.mxu0 %v4981_v44  ;;  %761 = vmatmul.f32.gmra.mxu1 %v4981_v44 }
  0x80   :  { %468 = vmatmul.f32.gmra.mxu2 %v5015_v62 }
  0x81   :  { %571 = vmatmul.f32.gmra.mxu3 %v237_v4 }
  0x82   :  { %682 = vmatmul.f32.gmra.mxu0 %v5000_v56  ;;  %765 = vmatmul.f32.gmra.mxu1 %v5000_v56 }
  0x88   :  { %473 = vmatmul.f32.gmra.mxu2 %v5037_v13 }
  0x89   :  { %577 = vmatmul.f32.gmra.mxu3 %v245_v26 }
  0x8a   :  { %686 = vmatmul.f32.gmra.mxu0 %v5023_v6  ;;  %769 = vmatmul.f32.gmra.mxu1 %v5023_v6 }
  0x90   :  { %478 = vmatmul.f32.gmra.mxu2 %v5059_v39  ;;  %v136_v39 = vld [vmem:[#allocation7] sm:$0xff] }
  0x91   :  { %583 = vmatmul.f32.gmra.mxu3 %v253_v47  ;;  %v818_v47 = vsel %vm144_vm0, %v136_v39, 0 }
  0x92   :  { %690 = vmatmul.f32.gmra.mxu0 %v5045_v29  ;;  %773 = vmatmul.f32.gmra.mxu1 %v5045_v29 }
  0x98   :  { %483 = vmatmul.f32.gmra.mxu2 %v260_v61 }
  0x99   :  { %589 = vmatmul.f32.gmra.mxu3 %v261_v10 }
  0x9a   :  { %694 = vmatmul.f32.gmra.mxu0 %v5067_v50  ;;  %777 = vmatmul.f32.gmra.mxu1 %v5067_v50 }
  0xa0   :  { %488 = vmatmul.f32.gmra.mxu2 %v268_v21 }
  0xa1   :  { %595 = vmatmul.f32.gmra.mxu3 %v269_v36 }
  0xa2   :  { %698 = vmatmul.f32.gmra.mxu0 %v267_v11  ;;  %781 = vmatmul.f32.gmra.mxu1 %v267_v11 }
  0xa7   :  { %v5133_v16 = vpop.f32.mrf.mxu0  ;;  %v5136_v23 = vpop.f32.mrf.mxu1 }
  0xa8   :  { %493 = vmatmul.f32.gmra.mxu2 %v4945_v17 }
  0xa9   :  { %601 = vmatmul.f32.gmra.mxu3 %v277_v24 }
  0xaa   :  { %702 = vmatmul.f32.gmra.mxu0 %v4932_v9  ;;  %785 = vmatmul.f32.gmra.mxu1 %v4932_v9 }
  0xab   :  { %v5141_v25 = vpop.f32.mrf.mxu2 }
  0xac   :  { %v5144_v28 = vpop.f32.mrf.mxu3 }
  0xaf   :  { %v5146_v32 = vpop.f32.mrf.mxu0  ;;  %v5149_v38 = vpop.f32.mrf.mxu1 }
  0xb0   :  { %498 = vmatmul.f32.gmra.mxu2 %v4951_v22 }
  0xb1   :  { %607 = vmatmul.f32.gmra.mxu3 %v285_v30 }
  0xb2   :  { %706 = vmatmul.f32.gmra.mxu0 %v4940_v15  ;;  %789 = vmatmul.f32.gmra.mxu1 %v4940_v15 }
  0xb3   :  { %v5154_v17 = vpop.f32.mrf.mxu2 }
  0xb4   :  { %v5157_v24 = vpop.f32.mrf.mxu3 }
  0xb7   :  { %v5159_v9 = vpop.f32.mrf.mxu0  ;;  %v5162_v44 = vpop.f32.mrf.mxu1 }
  0xb8   :  { %503 = vmatmul.f32.gmra.mxu2 %v4979_v43  ;;  %v377_v41 = vadd.f32 %v5162_v44, %v5159_v9 }
  0xb9   :  { %613 = vmatmul.f32.gmra.mxu3 %v293_v51 }
  0xba   :  { %710 = vmatmul.f32.gmra.mxu0 %v4965_v31  ;;  %793 = vmatmul.f32.gmra.mxu1 %v4965_v31 }
  0xbb   :  { %v5167_v22 = vpop.f32.mrf.mxu2 }
  0xbc   :  { %v5170_v30 = vpop.f32.mrf.mxu3 }
  0xbf   :  { %v5172_v15 = vpop.f32.mrf.mxu0  ;;  %v5175_v48 = vpop.f32.mrf.mxu1 }
  0xc0   :  { %508 = vmatmul.f32.gmra.mxu2 %v5007_v58  ;;  %v381_v44 = vadd.f32 %v5175_v48, %v5172_v15 }
  0xc1   :  { %619 = vmatmul.f32.gmra.mxu3 %v301_v1 }
  0xc2   :  { %714 = vmatmul.f32.gmra.mxu0 %v4995_v52  ;;  %797 = vmatmul.f32.gmra.mxu1 %v4995_v52 }
  0xc3   :  { %v5180_v43 = vpop.f32.mrf.mxu2 }
  0xc4   :  { %v5183_v51 = vpop.f32.mrf.mxu3 }
  0xc7   :  { %v5185_v31 = vpop.f32.mrf.mxu0  ;;  %v5188_v54 = vpop.f32.mrf.mxu1 }
  0xc8   :  { %513 = vmatmul.f32.gmra.mxu2 %v5029_v8  ;;  %v385_v48 = vadd.f32 %v5188_v54, %v5185_v31 }
  0xc9   :  { %625 = vmatmul.f32.gmra.mxu3 %v309_v19 }
  0xca   :  { %718 = vmatmul.f32.gmra.mxu0 %v5020_v2  ;;  %801 = vmatmul.f32.gmra.mxu1 %v5020_v2 }
  0xcb   :  { %v5193_v56 = vpop.f32.mrf.mxu2 }
  0xcc   :  { %v5196_v58 = vpop.f32.mrf.mxu3 }
  0xcf   :  { %v5198_v52 = vpop.f32.mrf.mxu0  ;;  %v5201_v62 = vpop.f32.mrf.mxu1 }
  0xd0   :  { %518 = vmatmul.f32.gmra.mxu2 %v5051_v34 }
  0xd1   :  { %631 = vmatmul.f32.gmra.mxu3 %v317_v42 }
  0xd2   :  { %722 = vmatmul.f32.gmra.mxu0 %v5042_v20  ;;  %805 = vmatmul.f32.gmra.mxu1 %v5042_v20 }
  0xd3   :  { %v5206_v1 = vpop.f32.mrf.mxu2 }
  0xd4   :  { %v5209_v4 = vpop.f32.mrf.mxu3 }
  0xd7   :  { %v5211_v2 = vpop.f32.mrf.mxu0  ;;  %v5214_v6 = vpop.f32.mrf.mxu1 }
  0xd8   :  { %523 = vmatmul.f32.gmra.mxu2 %v5073_v55  ;;  %v5240_v55 = vand.u32 4294901760, %v818_v47 }
  0xd9   :  { %637 = vmatmul.f32.gmra.mxu3 %v325_v3  ;;  %v373_v3 = vadd.f32 %v5149_v38, %v5146_v32 }
  0xda   :  { %726 = vmatmul.f32.gmra.mxu0 %v5064_v45  ;;  %809 = vmatmul.f32.gmra.mxu1 %v5064_v45  ;;  %v369_v45 = vadd.f32 %v5136_v23, %v5133_v16  ;;  %v5243_v0 = vsub.f32 %v818_v47, %v5240_v55 }
  0xdb   :  { %v5219_v8 = vpop.f32.mrf.mxu2 }
  0xdc   :  { %v5222_v13 = vpop.f32.mrf.mxu3 }
  0xdf   :  { %v5224_v19 = vpop.f32.mrf.mxu0  ;;  %v5227_v20 = vpop.f32.mrf.mxu1 }
  0xe0   :  { %528 = vmatmul.f32.gmra.mxu2 %v5090_v14  ;;  %v5249_v14 = vand.u32 4294901760, %v5243_v0 }
  0xe1   :  { %643 = vmatmul.f32.gmra.mxu3 %v333_v33 }
  0xe2   :  { %730 = vmatmul.f32.gmra.mxu0 %v5084_v5  ;;  %813 = vmatmul.f32.gmra.mxu1 %v5084_v5  ;;  %v844_v37 = vsub.f32 %v5243_v0, %v5249_v14 }
  0xe3   :  { %v5232_v26 = vpop.f32.mrf.mxu2 }
  0xe4   :  { %v5235_v29 = vpop.f32.mrf.mxu3  ;;  %v5260_v39 = vand.u32 4294901760, %v844_v37 }
  0xe7   :  { %v671_v34 = vpop.f32.mrf.mxu0  ;;  %v754_v42 = vpop.f32.mrf.mxu1 }
  0xeb   :  { %v454_v49 = vpop.f32.mrf.mxu2 }
  0xec   :  { %v455_v50 = vadd.f32 %v454_v49, %v369_v45  ;;  %v554_v53 = vpop.f32.mrf.mxu3 }
  0xee   :  { %v555_v57 = vadd.f32 %v554_v53, %v455_v50 }
  0xef   :  { %v675_v59 = vpop.f32.mrf.mxu0  ;;  %v758_v63 = vpop.f32.mrf.mxu1 }
  0xf0   :  { %v672_v61 = vadd.f32 %v671_v34, %v555_v57 }
  0xf2   :  { %v755_v5 = vadd.f32 %v754_v42, %v672_v61  ;;  %v5263_v42 = vand.u32 4294901760, %v5256_v40 }
  0xf3   :  { %v459_v10 = vpop.f32.mrf.mxu2 }
  0xf4   :  { %v460_v11 = vadd.f32 %v459_v10, %v373_v3  ;;  %v560_v12 = vpop.f32.mrf.mxu3  ;;  %v839_v21 = vand.u32 4294901760, %v755_v5  ;;  %v852_v9 = vsub.f32 %v5256_v40, %v5263_v42 }
  0xf6   :  { %v561_v27 = vadd.f32 %v560_v12, %v460_v11  ;;  %v879_v46 = vsub.f32 %v755_v5, %v839_v21  ;;  %v5270_v10 = vand.u32 4294901760, %v852_v9 }
  0xf7   :  { %v679_v33 = vpop.f32.mrf.mxu0  ;;  %v762_v36 = vpop.f32.mrf.mxu1 }
  0xf8   :  { %v676_v35 = vadd.f32 %v675_v59, %v561_v27  ;;  %v880_v49 = vand.u32 4294901760, %v879_v46 }
  0xfa   :  { %v759_v16 = vadd.f32 %v758_v63, %v676_v35  ;;  %v881_v61 = vsub.f32 %v879_v46, %v880_v49 }
  0xfb   :  { %v464_v23 = vpop.f32.mrf.mxu2 }
  0xfc   :  { %v837_v32 = vand.u32 4294901760, %v759_v16  ;;  %v465_v38 = vadd.f32 %v464_v23, %v377_v41  ;;  %v566_v34 = vpop.f32.mrf.mxu3  ;;  %v882_v27 = vand.u32 4294901760, %v881_v61 }
  0xfe   :  { %v873_v45 = vsub.f32 %v759_v16, %v837_v32  ;;  %v567_v47 = vadd.f32 %v566_v34, %v465_v38  ;;  %838 = vmatpush.msra.mxu2 %v837_v32 }
  0xff   :  { %v683_v50 = vpop.f32.mrf.mxu0  ;;  %v766_v57 = vpop.f32.mrf.mxu1 }
 0x100   :  { %840 = vmatpush.msra.mxu2 %v839_v21  ;;  %v874_v53 = vand.u32 4294901760, %v873_v45  ;;  %v680_v59 = vadd.f32 %v679_v33, %v567_v47 }
 0x101   :  { %846 = vmatmul.f32.vlgmr.msra.gmra.mxu2 %v5260_v39 }
 0x102   :  { %909 = vmatpush.msrb.mxu2 %v873_v45  ;;  %v875_v60 = vsub.f32 %v873_v45, %v874_v53  ;;  %v763_v11 = vadd.f32 %v762_v36, %v680_v59 }
 0x103   :  { %v469_v63 = vpop.f32.mrf.mxu2 }
 0x104   :  { %v470_v3 = vadd.f32 %v469_v63, %v381_v44  ;;  %912 = vmatpush.msrb.mxu2 %v879_v46  ;;  %v876_v5 = vand.u32 4294901760, %v875_v60  ;;  %v572_v7 = vpop.f32.mrf.mxu3  ;;  %v5276_v33 = vand.u32 4294901760, %v763_v11 }
 0x106   :  { %972 = vmatpush.msra.mxu2 %v874_v53  ;;  %v573_v12 = vadd.f32 %v572_v7, %v470_v3  ;;  %877 = vmatpush.msra.mxu3 %v876_v5  ;;  %v5281_v38 = vsub.f32 %v763_v11, %v5276_v33  ;;  %v393_v3 = vadd.f32 %v5214_v6, %v5211_v2 }
 0x107   :  { %v687_v35 = vpop.f32.mrf.mxu0  ;;  %v770_v15 = vpop.f32.mrf.mxu1 }
 0x108   :  { %976 = vmatpush.msra.mxu2 %v880_v49  ;;  %v684_v37 = vadd.f32 %v683_v50, %v573_v12  ;;  %883 = vmatpush.msra.mxu3 %v882_v27  ;;  %v1070_v50 = vand.u32 4294901760, %v5281_v38 }
 0x109   :  { %854 = vmatmul.f32.gmra.mxu2 %v5270_v10  ;;  %885 = vmatmul.f32.vlgmr.msra.gmra.mxu3 %v5240_v55 }
 0x10a   :  { %v767_v41 = vadd.f32 %v766_v57, %v684_v37  ;;  %939 = vmatpush.msrb.mxu3 %v837_v32 }
 0x10b   :  { %v474_v36 = vpop.f32.mrf.mxu2 }
 0x10c   :  { %v5278_v46 = vand.u32 4294901760, %v767_v41  ;;  %v475_v16 = vadd.f32 %v474_v36, %v385_v48  ;;  %941 = vmatpush.msrb.mxu3 %v839_v21  ;;  %v578_v23 = vpop.f32.mrf.mxu3 }
 0x10e   :  { %1001 = vmatpush.msra.mxu3 %v837_v32  ;;  %v5284_v34 = vsub.f32 %v767_v41, %v5278_v46  ;;  %v579_v45 = vadd.f32 %v578_v23, %v475_v16  ;;  %v389_v32 = vadd.f32 %v5201_v62, %v5198_v52  ;;  %v1071_v52 = vsub.f32 %v5281_v38, %v1070_v50 }
 0x10f   :  { %v691_v31 = vpop.f32.mrf.mxu0  ;;  %v774_v47 = vpop.f32.mrf.mxu1  ;;  %v397_v16 = vadd.f32 %v5227_v20, %v5224_v19 }
 0x110   :  { %1003 = vmatpush.msra.mxu3 %v839_v21  ;;  %v1064_v54 = vand.u32 4294901760, %v5284_v34  ;;  %v688_v49 = vadd.f32 %v687_v35, %v579_v45  ;;  %v1072_v11 = vand.u32 4294901760, %v1071_v52 }
 0x111   :  { %889 = vmatmul.f32.gmra.mxu3 %v5251_v18  ;;  %915 = vmatmul.f32.vlgmr.msrb.gmra.mxu2 %v5243_v0 }
 0x112   :  { %1028 = vmatpush.msrb.mxu2 %v5278_v46  ;;  %v1065_v21 = vsub.f32 %v5284_v34, %v1064_v54  ;;  %v771_v44 = vadd.f32 %v770_v15, %v688_v49 }
 0x113   :  { %v479_v53 = vpop.f32.mrf.mxu2 }
 0x114   :  { %v480_v57 = vadd.f32 %v479_v53, %v389_v32  ;;  %1030 = vmatpush.msrb.mxu2 %v5276_v33  ;;  %v584_v9 = vpop.f32.mrf.mxu3  ;;  %v1066_v61 = vand.u32 4294901760, %v1065_v21  ;;  %v5304_v5 = vand.u32 4294901760, %v771_v44  ;;  %v401_v21 = vadd.f32 %v5144_v28, %v5141_v25 }
 0x116   :  { %v585_v59 = vadd.f32 %v584_v9, %v480_v57  ;;  %v5309_v15 = vsub.f32 %v771_v44, %v5304_v5 }
 0x117   :  { %v695_v62 = vpop.f32.mrf.mxu0  ;;  %v778_v63 = vpop.f32.mrf.mxu1 }
 0x118   :  { %v692_v60 = vadd.f32 %v691_v31, %v585_v59  ;;  %v1260_v23 = vand.u32 4294901760, %v5309_v15 }
 0x119   :  { %920 = vmatmul.f32.gmra.mxu2 %v5256_v40  ;;  %945 = vmatmul.f32.vlgmr.msrb.gmra.mxu3 %v5249_v14 }
 0x11a   :  { %v775_v7 = vadd.f32 %v774_v47, %v692_v60  ;;  %1067 = vmatpush.msrb.mxu3 %v1066_v61 }
 0x11b   :  { %v484_v12 = vpop.f32.mrf.mxu2 }
 0x11c   :  { %v5306_v27 = vand.u32 4294901760, %v775_v7  ;;  %v485_v35 = vadd.f32 %v484_v12, %v393_v3  ;;  %1073 = vmatpush.msrb.mxu3 %v1072_v11  ;;  %v590_v37 = vpop.f32.mrf.mxu3  ;;  %v405_v11 = vadd.f32 %v5157_v24, %v5154_v17 }
 0x11e   :  { %v5312_v48 = vsub.f32 %v775_v7, %v5306_v27  ;;  %1381 = vmatpush.msra.mxu1 %v5306_v27  ;;  %v591_v6 = vadd.f32 %v590_v37, %v485_v35 }
 0x11f   :  { %v699_v2 = vpop.f32.mrf.mxu0  ;;  %v782_v36 = vpop.f32.mrf.mxu1 }
 0x120   :  { %1383 = vmatpush.msra.mxu1 %v5304_v5  ;;  %v1254_v41 = vand.u32 4294901760, %v5312_v48  ;;  %v696_v31 = vadd.f32 %v695_v62, %v591_v6 }
 0x121   :  { %951 = vmatmul.f32.gmra.mxu3 %v5263_v42  ;;  %978 = vmatmul.f32.vlgmr.msra.gmra.mxu2 %v5240_v55 }
 0x122   :  { %1099 = vmatpush.msra.mxu2 %v5284_v34  ;;  %1352 = vmatpush.msra.mxu0 %v1254_v41  ;;  %v779_v49 = vadd.f32 %v778_v63, %v696_v31 }
 0x123   :  { %v489_v45 = vpop.f32.mrf.mxu2  ;;  %1385 = vmatmul.f32.vlgmr.msra.gmra.mxu1 %v5240_v55 }
 0x124   :  { %v490_v47 = vadd.f32 %v489_v45, %v397_v16  ;;  %1102 = vmatpush.msra.mxu2 %v5281_v38  ;;  %1356 = vmatpush.msra.mxu0 %v1260_v23  ;;  %v596_v32 = vpop.f32.mrf.mxu3  ;;  %v5336_v59 = vand.u32 4294901760, %v779_v49  ;;  %v409_v38 = vadd.f32 %v5170_v30, %v5167_v22 }
 0x125   :  { %1358 = vmatmul.f32.vlgmr.msra.gmra.mxu0 %v5240_v55 }
 0x126   :  { %v597_v19 = vadd.f32 %v596_v32, %v490_v47  ;;  %v5347_v63 = vsub.f32 %v779_v49, %v5336_v59 }
 0x127   :  { %v703_v20 = vpop.f32.mrf.mxu0  ;;  %v786_v57 = vpop.f32.mrf.mxu1 }
 0x128   :  { %v700_v53 = vadd.f32 %v699_v2, %v597_v19 }
 0x129   :  { %982 = vmatmul.f32.gmra.mxu2 %v5251_v18  ;;  %1005 = vmatmul.f32.vlgmr.msra.gmra.mxu3 %v5240_v55 }
 0x12a   :  { %v783_v9 = vadd.f32 %v782_v36, %v700_v53  ;;  %1129 = vmatpush.msra.mxu3 %v5278_v46 }
 0x12b   :  { %v494_v44 = vpop.f32.mrf.mxu2  ;;  %1389 = vmatmul.f32.gmra.mxu1 %v5251_v18 }
 0x12c   :  { %v5338_v52 = vand.u32 4294901760, %v783_v9  ;;  %v495_v62 = vadd.f32 %v494_v44, %v401_v21  ;;  %1131 = vmatpush.msra.mxu3 %v5276_v33  ;;  %v602_v60 = vpop.f32.mrf.mxu3  ;;  %v1255_v44 = vsub.f32 %v5312_v48, %v1254_v41  ;;  %v417_v41 = vadd.f32 %v5196_v58, %v5193_v56 }
 0x12d   :  { %1362 = vmatmul.f32.gmra.mxu0 %v5251_v18 }
 0x12e   :  { %v5343_v61 = vsub.f32 %v783_v9, %v5338_v52  ;;  %v603_v25 = vadd.f32 %v602_v60, %v495_v62  ;;  %1509 = vmatpush.msrb.mxu1 %v5338_v52 }
 0x12f   :  { %v707_v28 = vpop.f32.mrf.mxu0  ;;  %v790_v7 = vpop.f32.mrf.mxu1 }
 0x130   :  { %v704_v3 = vadd.f32 %v703_v20, %v603_v25  ;;  %1479 = vmatpush.msrb.mxu0 %v5343_v61  ;;  %1511 = vmatpush.msrb.mxu1 %v5336_v59  ;;  %v413_v20 = vadd.f32 %v5183_v51, %v5180_v43  ;;  %v1261_v25 = vsub.f32 %v5309_v15, %v1260_v23 }
 0x131   :  { %1009 = vmatmul.f32.gmra.mxu3 %v5251_v18  ;;  %1036 = vmatmul.f32.vlgmr.msrb.gmra.mxu2 %v5260_v39 }
 0x132   :  { %v787_v12 = vadd.f32 %v786_v57, %v704_v3  ;;  %1162 = vmatpush.msrb.mxu2 %v1064_v54  ;;  %1482 = vmatpush.msrb.mxu0 %v5347_v63 }
 0x133   :  { %v499_v35 = vpop.f32.mrf.mxu2  ;;  %1515 = vmatmul.f32.vlgmr.msrb.gmra.mxu1 %v5249_v14 }
 0x134   :  { %v500_v37 = vadd.f32 %v499_v35, %v405_v11  ;;  %1166 = vmatpush.msrb.mxu2 %v1070_v50  ;;  %v608_v2 = vpop.f32.mrf.mxu3  ;;  %v5362_v6 = vand.u32 4294901760, %v787_v12  ;;  %v1262_v35 = vand.u32 4294901760, %v1261_v25 }
 0x135   :  { %1485 = vmatmul.f32.vlgmr.msrb.gmra.mxu0 %v5243_v0 }
 0x136   :  { %v609_v36 = vadd.f32 %v608_v2, %v500_v37  ;;  %v5367_v34 = vsub.f32 %v787_v12, %v5362_v6 }
 0x137   :  { %v711_v17 = vpop.f32.mrf.mxu0  ;;  %v794_v16 = vpop.f32.mrf.mxu1 }
 0x138   :  { %v708_v24 = vadd.f32 %v707_v28, %v609_v36 }
 0x139   :  { %1044 = vmatmul.f32.gmra.mxu2 %v5270_v10  ;;  %1075 = vmatmul.f32.vlgmr.msrb.gmra.mxu3 %v5240_v55 }
 0x13a   :  { %v791_v54 = vadd.f32 %v790_v7, %v708_v24  ;;  %1191 = vmatpush.msrb.mxu3 %v5278_v46  ;;  %v1640_v46 = vand.u32 4294901760, %v5367_v34  ;;  %v1256_v7 = vand.u32 4294901760, %v1255_v44  ;;  %v1444_v44 = vand.u32 4294901760, %v5343_v61 }
 0x13b   :  { %v504_v50 = vpop.f32.mrf.mxu2  ;;  %1521 = vmatmul.f32.gmra.mxu1 %v5263_v42 }
 0x13c   :  { %v5373_v45 = vand.u32 4294901760, %v791_v54  ;;  %1193 = vmatpush.msrb.mxu3 %v5276_v33  ;;  %v505_v31 = vadd.f32 %v504_v50, %v409_v38  ;;  %v614_v47 = vpop.f32.mrf.mxu3  ;;  %v1641_v53 = vsub.f32 %v5367_v34, %v1640_v46  ;;  %v421_v50 = vadd.f32 %v5209_v4, %v5206_v1 }
 0x13d   :  { %1490 = vmatmul.f32.gmra.mxu0 %v5256_v40 }
 0x13e   :  { %v5378_v32 = vsub.f32 %v791_v54, %v5373_v45  ;;  %1598 = vmatpush.msra.mxu0 %v5373_v45  ;;  %v615_v30 = vadd.f32 %v614_v47, %v505_v31  ;;  %v1642_v51 = vand.u32 4294901760, %v1641_v53 }
 0x13f   :  { %v715_v19 = vpop.f32.mrf.mxu0  ;;  %v798_v33 = vpop.f32.mrf.mxu1 }
 0x140   :  { %1600 = vmatpush.msra.mxu0 %v5362_v6  ;;  %v1634_v22 = vand.u32 4294901760, %v5378_v32  ;;  %v712_v62 = vadd.f32 %v711_v17, %v615_v30 }
 0x141   :  { %1079 = vmatmul.f32.gmra.mxu3 %v5251_v18  ;;  %1105 = vmatmul.f32.vlgmr.msra.gmra.mxu2 %v5243_v0 }
 0x142   :  { %1218 = vmatpush.msra.mxu2 %v5306_v27  ;;  %1732 = vmatpush.msrb.mxu0 %v1634_v22  ;;  %v1635_v49 = vsub.f32 %v5378_v32, %v1634_v22  ;;  %v795_v11 = vadd.f32 %v794_v16, %v712_v62  ;;  %v429_v62 = vadd.f32 %v5235_v29, %v5232_v26 }
 0x143   :  { %v509_v57 = vpop.f32.mrf.mxu2  ;;  %v1445_v29 = vsub.f32 %v5343_v61, %v1444_v44 }
 0x144   :  { %v510_v21 = vadd.f32 %v509_v57, %v413_v20  ;;  %1220 = vmatpush.msra.mxu2 %v5304_v5  ;;  %1736 = vmatpush.msrb.mxu0 %v1640_v46  ;;  %v1636_v9 = vand.u32 4294901760, %v1635_v49  ;;  %v620_v60 = vpop.f32.mrf.mxu3  ;;  %v5407_v17 = vand.u32 4294901760, %v795_v11 }
 0x145   :  { %1606 = vmatmul.f32.vlgmr.msra.gmra.mxu0 %v5260_v39 }
 0x146   :  { %v621_v43 = vadd.f32 %v620_v60, %v510_v21  ;;  %1637 = vmatpush.msra.mxu1 %v1636_v9  ;;  %v5418_v54 = vsub.f32 %v795_v11, %v5407_v17 }
 0x147   :  { %v719_v28 = vpop.f32.mrf.mxu0  ;;  %v802_v37 = vpop.f32.mrf.mxu1 }
 0x148   :  { %v716_v3 = vadd.f32 %v715_v19, %v621_v43  ;;  %1643 = vmatpush.msra.mxu1 %v1642_v51  ;;  %v1450_v43 = vand.u32 4294901760, %v5347_v63 }
 0x149   :  { %1110 = vmatmul.f32.gmra.mxu2 %v5256_v40  ;;  %1135 = vmatmul.f32.vlgmr.msra.gmra.mxu3 %v5249_v14 }
 0x14a   :  { %v799_v12 = vadd.f32 %v798_v33, %v716_v3  ;;  %1257 = vmatpush.msra.mxu3 %v1256_v7  ;;  %1645 = vmatmul.f32.vlgmr.msra.gmra.mxu1 %v5240_v55 }
 0x14b   :  { %1761 = vmatpush.msrb.mxu1 %v5373_v45  ;;  %v514_v23 = vpop.f32.mrf.mxu2 }
 0x14c   :  { %v5405_v2 = vand.u32 4294901760, %v799_v12  ;;  %v515_v36 = vadd.f32 %v514_v23, %v417_v41  ;;  %1263 = vmatpush.msra.mxu3 %v1262_v35  ;;  %v626_v24 = vpop.f32.mrf.mxu3  ;;  %v1446_v23 = vand.u32 4294901760, %v1445_v29 }
 0x14d   :  { %1763 = vmatpush.msrb.mxu1 %v5362_v6  ;;  %1614 = vmatmul.f32.gmra.mxu0 %v5270_v10 }
 0x14e   :  { %v5412_v56 = vsub.f32 %v799_v12, %v5405_v2  ;;  %v627_v58 = vadd.f32 %v626_v24, %v515_v36  ;;  %v1451_v12 = vsub.f32 %v5347_v63, %v1450_v43 }
 0x14f   :  { %1889 = vmatpush.msra.mxu1 %v5405_v2  ;;  %v723_v38 = vpop.f32.mrf.mxu0  ;;  %v806_v22 = vpop.f32.mrf.mxu1 }
 0x150   :  { %v720_v16 = vadd.f32 %v719_v28, %v627_v58  ;;  %1859 = vmatpush.msra.mxu0 %v5412_v56  ;;  %v1452_v36 = vand.u32 4294901760, %v1451_v12 }
 0x151   :  { %1891 = vmatpush.msra.mxu1 %v5407_v17  ;;  %1141 = vmatmul.f32.gmra.mxu3 %v5263_v42 }
 0x152   :  { %1168 = vmatmul.f32.vlgmr.msrb.gmra.mxu2 %v5240_v55  ;;  %v803_v31 = vadd.f32 %v802_v37, %v720_v16  ;;  %1649 = vmatmul.f32.gmra.mxu1 %v5251_v18 }
 0x153   :  { %1289 = vmatpush.msrb.mxu2 %v5312_v48  ;;  %1862 = vmatpush.msra.mxu0 %v5418_v54  ;;  %v519_v47 = vpop.f32.mrf.mxu2 }
 0x154   :  { %v520_v46 = vadd.f32 %v519_v47, %v421_v50  ;;  %v632_v19 = vpop.f32.mrf.mxu3  ;;  %v5429_v30 = vand.u32 4294901760, %v803_v31 }
 0x155   :  { %1292 = vmatpush.msrb.mxu2 %v5309_v15  ;;  %1738 = vmatmul.f32.vlgmr.msrb.gmra.mxu0 %v5240_v55 }
 0x156   :  { %v633_v33 = vadd.f32 %v632_v19, %v520_v46  ;;  %v5434_v1 = vsub.f32 %v803_v31, %v5429_v30 }
 0x157   :  { %v727_v48 = vpop.f32.mrf.mxu0  ;;  %v810_v9 = vpop.f32.mrf.mxu1 }
 0x158   :  { %v724_v20 = vadd.f32 %v723_v38, %v633_v33  ;;  %v2020_v21 = vand.u32 4294901760, %v5434_v1 }
 0x159   :  { %1195 = vmatmul.f32.vlgmr.msrb.gmra.mxu3 %v5240_v55 }
 0x15a   :  { %1172 = vmatmul.f32.gmra.mxu2 %v5251_v18  ;;  %v807_v4 = vadd.f32 %v806_v22, %v724_v20  ;;  %1319 = vmatpush.msrb.mxu3 %v5306_v27  ;;  %v425_v27 = vadd.f32 %v5222_v13, %v5219_v8  ;;  %v2021_v13 = vsub.f32 %v5434_v1, %v2020_v21 }
 0x15b   :  { %1765 = vmatmul.f32.vlgmr.msrb.gmra.mxu1 %v5240_v55  ;;  %v524_v15 = vpop.f32.mrf.mxu2 }
 0x15c   :  { %v5438_v49 = vand.u32 4294901760, %v807_v4  ;;  %1321 = vmatpush.msrb.mxu3 %v5304_v5  ;;  %v638_v53 = vpop.f32.mrf.mxu3  ;;  %v525_v60 = vadd.f32 %v524_v15, %v425_v27  ;;  %v2022_v41 = vand.u32 4294901760, %v2021_v13 }
 0x15d   :  { %1742 = vmatmul.f32.gmra.mxu0 %v5251_v18 }
 0x15e   :  { %v5443_v57 = vsub.f32 %v807_v4, %v5438_v49  ;;  %1978 = vmatpush.msrb.mxu0 %v5438_v49  ;;  %v639_v7 = vadd.f32 %v638_v53, %v525_v60 }
 0x15f   :  { %v731_v3 = vpop.f32.mrf.mxu0  ;;  %v814_v37 = vpop.f32.mrf.mxu1 }
 0x160   :  { %1980 = vmatpush.msrb.mxu0 %v5429_v30  ;;  %v2014_v5 = vand.u32 4294901760, %v5443_v57  ;;  %v728_v61 = vadd.f32 %v727_v48, %v639_v7 }
 0x161   :  { %1199 = vmatmul.f32.gmra.mxu3 %v5251_v18 }
 0x162   :  { %1226 = vmatmul.f32.vlgmr.msra.gmra.mxu2 %v5260_v39  ;;  %v2015_v8 = vsub.f32 %v5443_v57, %v2014_v5  ;;  %v811_v63 = vadd.f32 %v810_v9, %v728_v61 }
 0x163   :  { %1408 = vmatpush.msra.mxu2 %v5338_v52  ;;  %1769 = vmatmul.f32.gmra.mxu1 %v5251_v18  ;;  %v529_v51 = vpop.f32.mrf.mxu2 }
 0x164   :  { %v530_v25 = vadd.f32 %v529_v51, %v429_v62  ;;  %v2016_v26 = vand.u32 4294901760, %v2015_v8  ;;  %v644_v28 = vpop.f32.mrf.mxu3  ;;  %v5475_v16 = vand.u32 4294901760, %v811_v63 }
 0x165   :  { %1410 = vmatpush.msra.mxu2 %v5336_v59  ;;  %1865 = vmatmul.f32.vlgmr.msra.gmra.mxu0 %v5243_v0 }
 0x166   :  { %v645_v11 = vadd.f32 %v644_v28, %v530_v25  ;;  %2112 = vmatpush.msra.mxu0 %v2014_v5  ;;  %2017 = vmatpush.msrb.mxu1 %v2016_v26  ;;  %v5483_v50 = vsub.f32 %v811_v63, %v5475_v16  ;;  %v139_v63 = vld [vmem:[#allocation8 + $0x8] sm:$0xff] }
 0x168   :  { %v732_v35 = vadd.f32 %v731_v3, %v645_v11  ;;  %2116 = vmatpush.msra.mxu0 %v2020_v21  ;;  %2023 = vmatpush.msrb.mxu1 %v2022_v41 }
 0x169   :  { %1265 = vmatmul.f32.vlgmr.msra.gmra.mxu3 %v5240_v55 }
 0x16a   :  { %1234 = vmatmul.f32.gmra.mxu2 %v5270_v10  ;;  %1447 = vmatpush.msra.mxu3 %v1446_v23  ;;  %v815_v24 = vadd.f32 %v814_v37, %v732_v35 }
 0x16b   :  { %1895 = vmatmul.f32.vlgmr.msra.gmra.mxu1 %v5249_v14 }
 0x16c   :  { %2141 = vmatpush.msra.mxu1 %v5438_v49  ;;  %1453 = vmatpush.msra.mxu3 %v1452_v36  ;;  %v5471_v58 = vand.u32 4294901760, %v815_v24 }
 0x16d   :  { %1870 = vmatmul.f32.gmra.mxu0 %v5256_v40 }
 0x16e   :  { %2143 = vmatpush.msra.mxu1 %v5429_v30  ;;  %v5479_v38 = vsub.f32 %v815_v24, %v5471_v58 }
 0x171   :  { %1269 = vmatmul.f32.gmra.mxu3 %v5251_v18 }
 0x172   :  { %1295 = vmatmul.f32.vlgmr.msrb.gmra.mxu2 %v5243_v0 }
 0x173   :  { %1542 = vmatpush.msrb.mxu2 %v1444_v44  ;;  %1901 = vmatmul.f32.gmra.mxu1 %v5263_v42  ;;  %v5528_v44 = vld [vmem:[#allocation11] sm:$0xff] }
 0x175   :  { %1546 = vmatpush.msrb.mxu2 %v1450_v43  ;;  %1986 = vmatmul.f32.vlgmr.msrb.gmra.mxu0 %v5260_v39 }
 0x176   :  { %2239 = vmatpush.msrb.mxu0 %v5479_v38 }
 0x178   :  { %2242 = vmatpush.msrb.mxu0 %v5483_v50 }
 0x179   :  { %1325 = vmatmul.f32.vlgmr.msrb.gmra.mxu3 %v5249_v14 }
 0x17a   :  { %1300 = vmatmul.f32.gmra.mxu2 %v5256_v40  ;;  %1571 = vmatpush.msrb.mxu3 %v5338_v52 }
 0x17b   :  { %2025 = vmatmul.f32.vlgmr.msrb.gmra.mxu1 %v5240_v55 }
 0x17c   :  { %2269 = vmatpush.msrb.mxu1 %v5471_v58  ;;  %1573 = vmatpush.msrb.mxu3 %v5336_v59 }
 0x17d   :  { %1994 = vmatmul.f32.gmra.mxu0 %v5270_v10 }
 0x17e   :  { %2271 = vmatpush.msrb.mxu1 %v5475_v16 }
 0x181   :  { %1331 = vmatmul.f32.gmra.mxu3 %v5263_v42 }
 0x182   :  { %1416 = vmatmul.f32.vlgmr.msra.gmra.mxu2 %v5260_v39 }
 0x183   :  { %1669 = vmatpush.msra.mxu2 %v5378_v32  ;;  %2029 = vmatmul.f32.gmra.mxu1 %v5251_v18  ;;  %v1824_v32 = vand.u32 4294901760, %v5412_v56 }
 0x184   :  { %v847_v52 = vpop.f32.mrf.mxu2 }
 0x185   :  { %1672 = vmatpush.msra.mxu2 %v5367_v34  ;;  %2118 = vmatmul.f32.vlgmr.msra.gmra.mxu0 %v5240_v55  ;;  %v1830_v34 = vand.u32 4294901760, %v5418_v54 }
 0x187   :  { %v1831_v46 = vsub.f32 %v5418_v54, %v1830_v34 }
 0x189   :  { %1455 = vmatmul.f32.vlgmr.msra.gmra.mxu3 %v5240_v55  ;;  %v1832_v22 = vand.u32 4294901760, %v1831_v46 }
 0x18a   :  { %1424 = vmatmul.f32.gmra.mxu2 %v5270_v10  ;;  %1699 = vmatpush.msra.mxu3 %v5373_v45 }
 0x18b   :  { %2145 = vmatmul.f32.vlgmr.msra.gmra.mxu1 %v5240_v55 }
 0x18c   :  { %1701 = vmatpush.msra.mxu3 %v5362_v6  ;;  %v886_v59 = vpop.f32.mrf.mxu3  ;;  %v855_v31 = vpop.f32.mrf.mxu2  ;;  %v1825_v6 = vsub.f32 %v5412_v56, %v1824_v32 }
 0x18d   :  { %2122 = vmatmul.f32.gmra.mxu0 %v5251_v18  ;;  %v887_v4 = vadd.f32 %v886_v59, %v847_v52  ;;  %v2210_v52 = vand.u32 4294901760, %v5483_v50 }
 0x18e   :  { %v1826_v19 = vand.u32 4294901760, %v1825_v6 }
 0x191   :  { %1459 = vmatmul.f32.gmra.mxu3 %v5251_v18 }
 0x192   :  { %1548 = vmatmul.f32.vlgmr.msrb.gmra.mxu2 %v5240_v55 }
 0x193   :  { %1788 = vmatpush.msrb.mxu2 %v5405_v2  ;;  %2149 = vmatmul.f32.gmra.mxu1 %v5251_v18 }
 0x194   :  { %v890_v45 = vpop.f32.mrf.mxu3  ;;  %v916_v47 = vpop.f32.mrf.mxu2 }
 0x195   :  { %1790 = vmatpush.msrb.mxu2 %v5407_v17  ;;  %2245 = vmatmul.f32.vlgmr.msrb.gmra.mxu0 %v5243_v0  ;;  %v917_v15 = vadd.f32 %v916_v47, %v887_v4  ;;  %v891_v27 = vadd.f32 %v890_v45, %v855_v31 }
 0x199   :  { %1575 = vmatmul.f32.vlgmr.msrb.gmra.mxu3 %v5240_v55 }
 0x19a   :  { %1552 = vmatmul.f32.gmra.mxu2 %v5251_v18  ;;  %1827 = vmatpush.msrb.mxu3 %v1826_v19 }
 0x19b   :  { %2275 = vmatmul.f32.vlgmr.msrb.gmra.mxu1 %v5249_v14 }
 0x19c   :  { %1833 = vmatpush.msrb.mxu3 %v1832_v22  ;;  %v946_v33 = vpop.f32.mrf.mxu3  ;;  %v921_v20 = vpop.f32.mrf.mxu2 }
 0x19d   :  { %2250 = vmatmul.f32.gmra.mxu0 %v5256_v40  ;;  %v947_v48 = vadd.f32 %v946_v33, %v917_v15  ;;  %v922_v62 = vadd.f32 %v921_v20, %v891_v27  ;;  %v2211_v33 = vsub.f32 %v5483_v50, %v2210_v52 }
 0x1a0   :  { %v5604_v4 = vpop.f32.mrf.mxu1 }
 0x1a1   :  { %1579 = vmatmul.f32.gmra.mxu3 %v5251_v18 }
 0x1a2   :  { %1675 = vmatmul.f32.vlgmr.msra.gmra.mxu2 %v5243_v0  ;;  %v5581_v59 = vpop.f32.mrf.mxu0 }
 0x1a3   :  { %1922 = vmatpush.msra.mxu2 %v1824_v32  ;;  %2281 = vmatmul.f32.gmra.mxu1 %v5263_v42  ;;  %v2364_v32 = vsel %vm2359_vm2, %v139_v63, 0 }
 0x1a4   :  { %v952_v56 = vpop.f32.mrf.mxu3  ;;  %v979_v54 = vpop.f32.mrf.mxu2  ;;  %v5586_v45 = vand.u32 4294901760, %v2364_v32 }
 0x1a5   :  { %1926 = vmatpush.msra.mxu2 %v1830_v34  ;;  %v980_v53 = vadd.f32 %v979_v54, %v947_v48  ;;  %v953_v8 = vadd.f32 %v952_v56, %v922_v62  ;;  %v2212_v54 = vand.u32 4294901760, %v2211_v33 }
 0x1a6   :  { %v5592_v22 = vsub.f32 %v2364_v32, %v5586_v45 }
 0x1a8   :  { %v5597_v20 = vand.u32 4294901760, %v5592_v22 }
 0x1a9   :  { %1705 = vmatmul.f32.vlgmr.msra.gmra.mxu3 %v5249_v14 }
 0x1aa   :  { %1680 = vmatmul.f32.gmra.mxu2 %v5256_v40  ;;  %1951 = vmatpush.msra.mxu3 %v5405_v2  ;;  %v5606_v50 = vpop.f32.mrf.mxu0 }
 0x1ac   :  { %1953 = vmatpush.msra.mxu3 %v5407_v17  ;;  %v1006_v21 = vpop.f32.mrf.mxu3  ;;  %v983_v9 = vpop.f32.mrf.mxu2  ;;  %v5537_v17 = vld [vmem:[#allocation11 + $0x8] sm:$0xf] }
 0x1ad   :  { %v1007_v5 = vadd.f32 %v1006_v21, %v980_v53  ;;  %v984_v2 = vadd.f32 %v983_v9, %v953_v8  ;;  %v5615_v21 = vpop.f32.mrf.mxu1 }
 0x1af   :  { %v2343_v60 = vmul.f32 %v1007_v5, %v5528_v44 }
 0x1b1   :  { %1711 = vmatmul.f32.gmra.mxu3 %v5263_v42  ;;  %v5534_v13 = vand.u32 4294901760, %v2343_v60 }
 0x1b2   :  { %1796 = vmatmul.f32.vlgmr.msrb.gmra.mxu2 %v5260_v39  ;;  %v5617_v9 = vpop.f32.mrf.mxu0 }
 0x1b3   :  { %2049 = vmatpush.msrb.mxu2 %v5443_v57  ;;  %v5543_v29 = vsub.f32 %v2343_v60, %v5534_v13  ;;  %v138_v57 = vld [vmem:[#allocation8] sm:$0xff] }
 0x1b4   :  { %v1010_v43 = vpop.f32.mrf.mxu3  ;;  %v5539_v51 = vpop.f32.mrf.mxu2  ;;  %v2361_v3 = vsel %vm2359_vm2, %v138_v57, 0 }
 0x1b5   :  { %2052 = vmatpush.msrb.mxu2 %v5434_v1  ;;  %v1011_v25 = vadd.f32 %v1010_v43, %v984_v2  ;;  %v5552_v7 = vand.u32 4294901760, %v2361_v3  ;;  %v2427_v35 = vand.u32 4294901760, %v5543_v29 }
 0x1b7   :  { %v2344_v26 = vmul.f32 %v1011_v25, %v5537_v17  ;;  %v5565_v23 = vsub.f32 %v2361_v3, %v5552_v7  ;;  %v2428_v36 = vsub.f32 %v5543_v29, %v2427_v35 }
 0x1b9   :  { %v2368_v28 = vsel %vm2366_vm1, %v2344_v26, 0  ;;  %1835 = vmatmul.f32.vlgmr.msrb.gmra.mxu3 %v5240_v55  ;;  %v5570_v37 = vand.u32 4294901760, %v5565_v23  ;;  %v2429_v19 = vand.u32 4294901760, %v2428_v36 }
 0x1ba   :  { %1804 = vmatmul.f32.gmra.mxu2 %v5270_v10  ;;  %v5548_v1 = vand.u32 4294901760, %v2368_v28  ;;  %2079 = vmatpush.msrb.mxu3 %v5438_v49  ;;  %v5628_v60 = vpop.f32.mrf.mxu0 }
 0x1bb   :  { %v2391_v24 = vsub.f32 %v5565_v23, %v5570_v37 }
 0x1bc   :  { %v5555_v11 = vsub.f32 %v2368_v28, %v5548_v1  ;;  %2081 = vmatpush.msrb.mxu3 %v5429_v30  ;;  %v5558_v41 = vpop.f32.mrf.mxu3  ;;  %v5560_v12 = vpop.f32.mrf.mxu2  ;;  %2385 = vmatpush.msra.mxu0 %v5548_v1  ;;  %v2204_v30 = vand.u32 4294901760, %v5479_v38 }
 0x1bd   :  { %v5584_v34 = vand.u32 4294901760, %v2391_v24  ;;  %v1077_v62 = vadd.f32 %v5558_v41, %v5539_v51 }
 0x1be   :  { %2387 = vmatpush.msra.mxu0 %v5534_v13  ;;  %v2421_v49 = vand.u32 4294901760, %v5555_v11  ;;  %v2205_v47 = vsub.f32 %v5479_v38, %v2204_v30  ;;  %v2399_v38 = vsub.f32 %v5592_v22, %v5597_v20 }
 0x1bf   :  { %2393 = vmatmul.f32.vlgmr.msra.gmra.mxu0 %v5584_v34 }
 0x1c0   :  { %v2422_v61 = vsub.f32 %v5555_v11, %v2421_v49  ;;  %2519 = vmatpush.msrb.mxu0 %v2421_v49  ;;  %v2206_v56 = vand.u32 4294901760, %v2205_v47  ;;  %v5609_v15 = vand.u32 4294901760, %v2399_v38 }
 0x1c1   :  { %1839 = vmatmul.f32.gmra.mxu3 %v5251_v18 }
 0x1c2   :  { %1928 = vmatmul.f32.vlgmr.msra.gmra.mxu2 %v5240_v55  ;;  %v2423_v31 = vand.u32 4294901760, %v2422_v61  ;;  %2523 = vmatpush.msrb.mxu0 %v2427_v35  ;;  %v5639_v28 = vpop.f32.mrf.mxu0 }
 0x1c3   :  { %2168 = vmatpush.msra.mxu2 %v5471_v58 }
 0x1c4   :  { %v1080_v6 = vpop.f32.mrf.mxu3  ;;  %v1106_v46 = vpop.f32.mrf.mxu2  ;;  %2424 = vmatpush.msra.mxu1 %v2423_v31 }
 0x1c5   :  { %2170 = vmatpush.msra.mxu2 %v5475_v16  ;;  %v1107_v8 = vadd.f32 %v1106_v46, %v1077_v62  ;;  %v1081_v25 = vadd.f32 %v1080_v6, %v5560_v12 }
 0x1c6   :  { %2430 = vmatpush.msra.mxu1 %v2429_v19 }
 0x1c7   :  { %2432 = vmatmul.f32.vlgmr.msra.gmra.mxu1 %v5552_v7  ;;  %2401 = vmatmul.f32.gmra.mxu0 %v5609_v15 }
 0x1c8   :  { %2548 = vmatpush.msrb.mxu1 %v5548_v1 }
 0x1c9   :  { %1955 = vmatmul.f32.vlgmr.msra.gmra.mxu3 %v5240_v55 }
 0x1ca   :  { %1932 = vmatmul.f32.gmra.mxu2 %v5251_v18  ;;  %2207 = vmatpush.msra.mxu3 %v2206_v56  ;;  %v5652_v61 = vpop.f32.mrf.mxu0 }
 0x1cb   :  { %2550 = vmatpush.msrb.mxu1 %v5534_v13 }
 0x1cc   :  { %2213 = vmatpush.msra.mxu3 %v2212_v54  ;;  %v1136_v48 = vpop.f32.mrf.mxu3  ;;  %v1111_v53 = vpop.f32.mrf.mxu2 }
 0x1cf   :  { %2436 = vmatmul.f32.gmra.mxu1 %v5586_v45  ;;  %2525 = vmatmul.f32.vlgmr.msrb.gmra.mxu0 %v5552_v7 }
 0x1d1   :  { %1959 = vmatmul.f32.gmra.mxu3 %v5251_v18 }
 0x1d2   :  { %2055 = vmatmul.f32.vlgmr.msrb.gmra.mxu2 %v5243_v0  ;;  %v5626_v0 = vpop.f32.mrf.mxu1 }
 0x1d3   :  { %2302 = vmatpush.msrb.mxu2 %v2204_v30 }
 0x1d4   :  { %v1142_v27 = vpop.f32.mrf.mxu3 }
 0x1d5   :  { %2306 = vmatpush.msrb.mxu2 %v2210_v52  ;;  %v1169_v5 = vpop.f32.mrf.mxu2 }
 0x1d7   :  { %2552 = vmatmul.f32.vlgmr.msrb.gmra.mxu1 %v5552_v7  ;;  %2529 = vmatmul.f32.gmra.mxu0 %v5586_v45 }
 0x1d9   :  { %2085 = vmatmul.f32.vlgmr.msrb.gmra.mxu3 %v5249_v14  ;;  %v1137_v14 = vadd.f32 %v1136_v48, %v1107_v8 }
 0x1da   :  { %2060 = vmatmul.f32.gmra.mxu2 %v5256_v40  ;;  %2331 = vmatpush.msrb.mxu3 %v5471_v58  ;;  %v1112_v40 = vadd.f32 %v1111_v53, %v1081_v25 }
 0x1db   :  { %v1170_v51 = vadd.f32 %v1169_v5, %v1137_v14 }
 0x1dc   :  { %2333 = vmatpush.msrb.mxu3 %v5475_v16  ;;  %v1196_v2 = vpop.f32.mrf.mxu3  ;;  %v1143_v26 = vadd.f32 %v1142_v27, %v1112_v40  ;;  %v5637_v16 = vpop.f32.mrf.mxu1 }
 0x1dd   :  { %v1173_v43 = vpop.f32.mrf.mxu2  ;;  %v1197_v58 = vadd.f32 %v1196_v2, %v1170_v51 }
 0x1de   :  { %v1174_v57 = vadd.f32 %v1173_v43, %v1143_v26 }
 0x1df   :  { %2556 = vmatmul.f32.gmra.mxu1 %v5586_v45  ;;  %v2345_v35 = vmul.f32 %v1197_v58, %v5528_v44 }
 0x1e1   :  { %2091 = vmatmul.f32.gmra.mxu3 %v5263_v42 }
 0x1e2   :  { %2176 = vmatmul.f32.vlgmr.msra.gmra.mxu2 %v5260_v39  ;;  %v5647_v39 = vand.u32 4294901760, %v2345_v35 }
 0x1e3   :  { %2456 = vmatpush.msra.mxu2 %v5555_v11 }
 0x1e4   :  { %v1200_v3 = vpop.f32.mrf.mxu3  ;;  %v5650_v30 = vpop.f32.mrf.mxu1  ;;  %v2619_v63 = vsub.f32 %v2345_v35, %v5647_v39 }
 0x1e5   :  { %v1227_v41 = vpop.f32.mrf.mxu2  ;;  %2459 = vmatpush.msra.mxu2 %v5543_v29  ;;  %v1201_v12 = vadd.f32 %v1200_v3, %v1174_v57 }
 0x1e7   :  { %v2346_v49 = vmul.f32 %v1201_v12, %v5537_v17 }
 0x1e9   :  { %v2561_v42 = vsel %vm2366_vm1, %v2346_v49, 0  ;;  %2215 = vmatmul.f32.vlgmr.msra.gmra.mxu3 %v5240_v55 }
 0x1ea   :  { %2184 = vmatmul.f32.gmra.mxu2 %v5270_v10  ;;  %v2577_v11 = vand.u32 4294901760, %v2561_v42  ;;  %2486 = vmatpush.msra.mxu3 %v5548_v1  ;;  %v2620_v1 = vand.u32 4294901760, %v2619_v63 }
 0x1ec   :  { %v2613_v29 = vsub.f32 %v2561_v42, %v2577_v11  ;;  %v1266_v36 = vpop.f32.mrf.mxu3  ;;  %2488 = vmatpush.msra.mxu3 %v5534_v13  ;;  %2679 = vmatpush.msra.mxu1 %v2577_v11  ;;  %v5661_v52 = vpop.f32.mrf.mxu1  ;;  %v2621_v47 = vsub.f32 %v2619_v63, %v2620_v1 }
 0x1ed   :  { %v1235_v24 = vpop.f32.mrf.mxu2  ;;  %v5663_v13 = vpop.f32.mrf.mxu0  ;;  %v1267_v19 = vadd.f32 %v1266_v36, %v1227_v41 }
 0x1ee   :  { %2649 = vmatpush.msra.mxu0 %v2613_v29  ;;  %2681 = vmatpush.msra.mxu1 %v5647_v39  ;;  %v2614_v10 = vand.u32 4294901760, %v2613_v29  ;;  %v2622_v33 = vand.u32 4294901760, %v2621_v47 }
 0x1ef   :  { %2685 = vmatmul.f32.vlgmr.msra.gmra.mxu1 %v5570_v37 }
 0x1f0   :  { %2652 = vmatpush.msra.mxu0 %v2619_v63  ;;  %v2615_v6 = vsub.f32 %v2613_v29, %v2614_v10 }
 0x1f1   :  { %2219 = vmatmul.f32.gmra.mxu3 %v5251_v18  ;;  %2655 = vmatmul.f32.vlgmr.msra.gmra.mxu0 %v5565_v23 }
 0x1f2   :  { %2308 = vmatmul.f32.vlgmr.msrb.gmra.mxu2 %v5240_v55  ;;  %v2616_v46 = vand.u32 4294901760, %v2615_v6 }
 0x1f3   :  { %2578 = vmatpush.msrb.mxu2 %v2577_v11 }
 0x1f4   :  { %v1270_v31 = vpop.f32.mrf.mxu3  ;;  %v5670_v56 = vpop.f32.mrf.mxu1 }
 0x1f5   :  { %v1296_v32 = vpop.f32.mrf.mxu2  ;;  %2580 = vmatpush.msrb.mxu2 %v5647_v39  ;;  %v5672_v38 = vpop.f32.mrf.mxu0  ;;  %v1271_v62 = vadd.f32 %v1270_v31, %v1235_v24 }
 0x1f6   :  { %v1297_v54 = vadd.f32 %v1296_v32, %v1267_v19 }
 0x1f7   :  { %2691 = vmatmul.f32.gmra.mxu1 %v5597_v20 }
 0x1f9   :  { %2335 = vmatmul.f32.vlgmr.msrb.gmra.mxu3 %v5240_v55  ;;  %2660 = vmatmul.f32.gmra.mxu0 %v5592_v22 }
 0x1fa   :  { %2312 = vmatmul.f32.gmra.mxu2 %v5251_v18  ;;  %2617 = vmatpush.msrb.mxu3 %v2616_v46 }
 0x1fc   :  { %v1326_v48 = vpop.f32.mrf.mxu3  ;;  %2623 = vmatpush.msrb.mxu3 %v2622_v33  ;;  %v5678_v8 = vpop.f32.mrf.mxu1 }
 0x1fd   :  { %v1301_v53 = vpop.f32.mrf.mxu2  ;;  %v1327_v27 = vadd.f32 %v1326_v48, %v1297_v54  ;;  %v5680_v43 = vpop.f32.mrf.mxu0 }
 0x1fe   :  { %v1302_v2 = vadd.f32 %v1301_v53, %v1271_v62 }
 0x1ff   :  { %v1360_v5 = vadd.f32 %v5581_v59, %v1327_v27 }
 0x201   :  { %2339 = vmatmul.f32.gmra.mxu3 %v5251_v18  ;;  %v1387_v55 = vadd.f32 %v5604_v4, %v1360_v5 }
 0x202   :  { %2462 = vmatmul.f32.vlgmr.msra.gmra.mxu2 %v5565_v23 }
 0x203   :  { %2712 = vmatpush.msra.mxu2 %v2614_v10  ;;  %v2347_v14 = vmul.f32 %v1387_v55, %v5528_v44 }
 0x204   :  { %v1332_v25 = vpop.f32.mrf.mxu3  ;;  %v5688_v58 = vpop.f32.mrf.mxu1 }
 0x205   :  { %v1417_v40 = vpop.f32.mrf.mxu2  ;;  %2716 = vmatpush.msra.mxu2 %v2620_v1  ;;  %v1333_v51 = vadd.f32 %v1332_v25, %v1302_v2  ;;  %v2772_v26 = vand.u32 4294901760, %v2347_v14 }
 0x207   :  { %v1364_v59 = vadd.f32 %v5606_v50, %v1333_v51  ;;  %v2812_v41 = vsub.f32 %v2347_v14, %v2772_v26  ;;  %v5692_v50 = vpop.f32.mrf.mxu0 }
 0x209   :  { %2492 = vmatmul.f32.vlgmr.msra.gmra.mxu3 %v5570_v37  ;;  %v1391_v18 = vadd.f32 %v5615_v21, %v1364_v59  ;;  %v2813_v42 = vand.u32 4294901760, %v2812_v41 }
 0x20a   :  { %2467 = vmatmul.f32.gmra.mxu2 %v5592_v22  ;;  %2741 = vmatpush.msra.mxu3 %v2577_v11 }
 0x20b   :  { %v2348_v4 = vmul.f32 %v1391_v18, %v5537_v17  ;;  %v2814_v24 = vsub.f32 %v2812_v41, %v2813_v42 }
 0x20c   :  { %v1456_v57 = vpop.f32.mrf.mxu3  ;;  %2743 = vmatpush.msra.mxu3 %v5647_v39  ;;  %v5698_v10 = vpop.f32.mrf.mxu1 }
 0x20d   :  { %v1425_v3 = vpop.f32.mrf.mxu2  ;;  %v2754_v12 = vsel %vm2366_vm1, %v2348_v4, 0  ;;  %v1457_v29 = vadd.f32 %v1456_v57, %v1417_v40  ;;  %v2815_v32 = vand.u32 4294901760, %v2814_v24 }
 0x20e   :  { %v2770_v35 = vand.u32 4294901760, %v2754_v12 }
 0x20f   :  { %v1487_v63 = vadd.f32 %v5617_v9, %v1457_v29  ;;  %v5700_v31 = vpop.f32.mrf.mxu0 }
 0x210   :  { %v2806_v49 = vsub.f32 %v2754_v12, %v2770_v35  ;;  %2771 = vmatpush.msrb.mxu0 %v2770_v35  ;;  %v1651_v12 = vadd.f32 %v5661_v52, %v5652_v61 }
 0x211   :  { %2498 = vmatmul.f32.gmra.mxu3 %v5597_v20  ;;  %v1517_v47 = vadd.f32 %v5626_v0, %v1487_v63 }
 0x212   :  { %2586 = vmatmul.f32.vlgmr.msrb.gmra.mxu2 %v5584_v34  ;;  %2773 = vmatpush.msrb.mxu0 %v2772_v26  ;;  %v2807_v21 = vand.u32 4294901760, %v2806_v49 }
 0x213   :  { %2842 = vmatpush.msrb.mxu2 %v2806_v49  ;;  %2779 = vmatmul.f32.vlgmr.msrb.gmra.mxu0 %v5584_v34 }
 0x214   :  { %v1460_v39 = vpop.f32.mrf.mxu3  ;;  %v2808_v36 = vsub.f32 %v2806_v49, %v2807_v21  ;;  %2905 = vmatpush.msra.mxu0 %v2807_v21  ;;  %v5708_v0 = vpop.f32.mrf.mxu1 }
 0x215   :  { %v1549_v11 = vpop.f32.mrf.mxu2  ;;  %2845 = vmatpush.msrb.mxu2 %v2812_v41  ;;  %v1461_v6 = vadd.f32 %v1460_v39, %v1425_v3 }
 0x216   :  { %v2809_v1 = vand.u32 4294901760, %v2808_v36  ;;  %2909 = vmatpush.msra.mxu0 %v2813_v42  ;;  %v1550_v46 = vadd.f32 %v1549_v11, %v1517_v47 }
 0x217   :  { %v1492_v54 = vadd.f32 %v5628_v60, %v1461_v6  ;;  %v5714_v27 = vpop.f32.mrf.mxu0 }
 0x218   :  { %2810 = vmatpush.msrb.mxu1 %v2809_v1 }
 0x219   :  { %2625 = vmatmul.f32.vlgmr.msrb.gmra.mxu3 %v5552_v7  ;;  %v1523_v53 = vadd.f32 %v5637_v16, %v1492_v54  ;;  %v1647_v16 = vadd.f32 %v5650_v30, %v5639_v28 }
 0x21a   :  { %2594 = vmatmul.f32.gmra.mxu2 %v5609_v15  ;;  %2872 = vmatpush.msrb.mxu3 %v2770_v35 }
 0x21b   :  { %2816 = vmatpush.msrb.mxu1 %v2815_v32  ;;  %2787 = vmatmul.f32.gmra.mxu0 %v5609_v15 }
 0x21c   :  { %2818 = vmatmul.f32.vlgmr.msrb.gmra.mxu1 %v5552_v7  ;;  %v1576_v9 = vpop.f32.mrf.mxu3  ;;  %2874 = vmatpush.msrb.mxu3 %v2772_v26  ;;  %v5724_v51 = vpop.f32.mrf.mxu1 }
 0x21d   :  { %v1553_v19 = vpop.f32.mrf.mxu2  ;;  %2934 = vmatpush.msra.mxu1 %v2770_v35  ;;  %v1577_v33 = vadd.f32 %v1576_v9, %v1550_v46 }
 0x21e   :  { %v1554_v5 = vadd.f32 %v1553_v19, %v1523_v53 }
 0x21f   :  { %2936 = vmatpush.msra.mxu1 %v2772_v26  ;;  %v2349_v48 = vmul.f32 %v1577_v33, %v5528_v44  ;;  %v5728_v18 = vpop.f32.mrf.mxu0 }
 0x221   :  { %2629 = vmatmul.f32.gmra.mxu3 %v5586_v45  ;;  %v2965_v62 = vand.u32 4294901760, %v2349_v48 }
 0x222   :  { %2718 = vmatmul.f32.vlgmr.msra.gmra.mxu2 %v5552_v7 }
 0x223   :  { %2911 = vmatmul.f32.vlgmr.msra.gmra.mxu0 %v5552_v7  ;;  %v3005_v14 = vsub.f32 %v2349_v48, %v2965_v62 }
 0x224   :  { %2822 = vmatmul.f32.gmra.mxu1 %v5586_v45  ;;  %v1580_v60 = vpop.f32.mrf.mxu3  ;;  %v5738_v61 = vpop.f32.mrf.mxu1 }
 0x225   :  { %v1676_v55 = vpop.f32.mrf.mxu2  ;;  %v1581_v2 = vadd.f32 %v1580_v60, %v1554_v5  ;;  %v3006_v30 = vand.u32 4294901760, %v3005_v14 }
 0x226   :  { %v1677_v26 = vadd.f32 %v1676_v55, %v1647_v16 }
 0x227   :  { %v2350_v25 = vmul.f32 %v1581_v2, %v5537_v17  ;;  %v3007_v42 = vsub.f32 %v3005_v14, %v3006_v30  ;;  %v5741_v63 = vpop.f32.mrf.mxu0 }
 0x229   :  { %v2947_v40 = vsel %vm2366_vm1, %v2350_v25, 0  ;;  %2745 = vmatmul.f32.vlgmr.msra.gmra.mxu3 %v5552_v7  ;;  %v3008_v36 = vand.u32 4294901760, %v3007_v42 }
 0x22a   :  { %2722 = vmatmul.f32.gmra.mxu2 %v5586_v45  ;;  %v2963_v59 = vand.u32 4294901760, %v2947_v40 }
 0x22b   :  { %2915 = vmatmul.f32.gmra.mxu0 %v5586_v45 }
 0x22c   :  { %2938 = vmatmul.f32.vlgmr.msra.gmra.mxu1 %v5552_v7  ;;  %v2999_v4 = vsub.f32 %v2947_v40, %v2963_v59  ;;  %v1706_v57 = vpop.f32.mrf.mxu3  ;;  %2964 = vmatpush.msra.mxu2 %v2963_v59  ;;  %v5751_v19 = vpop.f32.mrf.mxu1 }
 0x22d   :  { %v1681_v28 = vpop.f32.mrf.mxu2  ;;  %3065 = vmatpush.msrb.mxu1 %v2963_v59  ;;  %v1707_v3 = vadd.f32 %v1706_v57, %v1677_v26 }
 0x22e   :  { %2966 = vmatpush.msra.mxu2 %v2965_v62  ;;  %v3000_v41 = vand.u32 4294901760, %v2999_v4  ;;  %3035 = vmatpush.msrb.mxu0 %v2999_v4  ;;  %v1682_v39 = vadd.f32 %v1681_v28, %v1651_v12 }
 0x22f   :  { %v1740_v35 = vadd.f32 %v5663_v13, %v1707_v3  ;;  %3067 = vmatpush.msrb.mxu1 %v2965_v62  ;;  %v5753_v54 = vpop.f32.mrf.mxu0 }
 0x230   :  { %v3001_v49 = vsub.f32 %v2999_v4, %v3000_v41  ;;  %3038 = vmatpush.msrb.mxu0 %v3005_v14 }
 0x231   :  { %2749 = vmatmul.f32.gmra.mxu3 %v5586_v45  ;;  %v1767_v29 = vadd.f32 %v5670_v56, %v1740_v35 }
 0x232   :  { %2848 = vmatmul.f32.vlgmr.msrb.gmra.mxu2 %v5565_v23  ;;  %v3002_v21 = vand.u32 4294901760, %v3001_v49 }
 0x233   :  { %3098 = vmatpush.msrb.mxu2 %v3000_v41  ;;  %3041 = vmatmul.f32.vlgmr.msrb.gmra.mxu0 %v5565_v23  ;;  %v2351_v13 = vmul.f32 %v1767_v29, %v5528_v44 }
 0x234   :  { %2942 = vmatmul.f32.gmra.mxu1 %v5586_v45  ;;  %v1712_v52 = vpop.f32.mrf.mxu3  ;;  %3003 = vmatpush.msra.mxu3 %v3002_v21  ;;  %v5760_v14 = vpop.f32.mrf.mxu1 }
 0x235   :  { %v1797_v11 = vpop.f32.mrf.mxu2  ;;  %3102 = vmatpush.msrb.mxu2 %v3006_v30  ;;  %v1713_v24 = vadd.f32 %v1712_v52, %v1682_v39  ;;  %v3158_v1 = vand.u32 4294901760, %v2351_v13 }
 0x236   :  { %3009 = vmatpush.msra.mxu3 %v3008_v36 }
 0x237   :  { %v1744_v56 = vadd.f32 %v5672_v38, %v1713_v24  ;;  %v3198_v9 = vsub.f32 %v2351_v13, %v3158_v1  ;;  %v5765_v4 = vpop.f32.mrf.mxu0 }
 0x239   :  { %2878 = vmatmul.f32.vlgmr.msrb.gmra.mxu3 %v5570_v37  ;;  %v1771_v32 = vadd.f32 %v5678_v8, %v1744_v56  ;;  %v3199_v8 = vand.u32 4294901760, %v3198_v9 }
 0x23a   :  { %2853 = vmatmul.f32.gmra.mxu2 %v5592_v22  ;;  %3127 = vmatpush.msrb.mxu3 %v2963_v59 }
 0x23b   :  { %v2352_v6 = vmul.f32 %v1771_v32, %v5537_v17  ;;  %3046 = vmatmul.f32.gmra.mxu0 %v5592_v22  ;;  %v3200_v2 = vsub.f32 %v3198_v9, %v3199_v8 }
 0x23c   :  { %3071 = vmatmul.f32.vlgmr.msrb.gmra.mxu1 %v5570_v37  ;;  %v1836_v47 = vpop.f32.mrf.mxu3  ;;  %3129 = vmatpush.msrb.mxu3 %v2965_v62  ;;  %v5774_v12 = vpop.f32.mrf.mxu1 }
 0x23d   :  { %v1805_v46 = vpop.f32.mrf.mxu2  ;;  %v3140_v38 = vsel %vm2366_vm1, %v2352_v6, 0  ;;  %v1837_v53 = vadd.f32 %v1836_v47, %v1797_v11  ;;  %v3201_v40 = vand.u32 4294901760, %v3200_v2 }
 0x23e   :  { %v3156_v33 = vand.u32 4294901760, %v3140_v38 }
 0x23f   :  { %v1867_v25 = vadd.f32 %v5680_v43, %v1837_v53  ;;  %v5778_v49 = vpop.f32.mrf.mxu0 }
 0x240   :  { %v3192_v48 = vsub.f32 %v3140_v38, %v3156_v33  ;;  %3157 = vmatpush.msra.mxu0 %v3156_v33 }
 0x241   :  { %2884 = vmatmul.f32.gmra.mxu3 %v5597_v20  ;;  %v1897_v26 = vadd.f32 %v5688_v58, %v1867_v25 }
 0x242   :  { %2972 = vmatmul.f32.vlgmr.msra.gmra.mxu2 %v5584_v34  ;;  %3159 = vmatpush.msra.mxu0 %v3158_v1  ;;  %v3193_v5 = vand.u32 4294901760, %v3192_v48 }
 0x243   :  { %3228 = vmatpush.msra.mxu2 %v3192_v48  ;;  %3165 = vmatmul.f32.vlgmr.msra.gmra.mxu0 %v5584_v34 }
 0x244   :  { %3077 = vmatmul.f32.gmra.mxu1 %v5597_v20  ;;  %v1840_v62 = vpop.f32.mrf.mxu3  ;;  %v3194_v55 = vsub.f32 %v3192_v48, %v3193_v5  ;;  %3291 = vmatpush.msrb.mxu0 %v3193_v5  ;;  %v5788_v24 = vpop.f32.mrf.mxu1 }
 0x245   :  { %v1929_v60 = vpop.f32.mrf.mxu2  ;;  %3231 = vmatpush.msra.mxu2 %v3198_v9  ;;  %v1841_v59 = vadd.f32 %v1840_v62, %v1805_v46  ;;  %v2031_v46 = vadd.f32 %v5724_v51, %v5714_v27 }
 0x246   :  { %v3195_v16 = vand.u32 4294901760, %v3194_v55  ;;  %3295 = vmatpush.msrb.mxu0 %v3199_v8  ;;  %v1930_v57 = vadd.f32 %v1929_v60, %v1897_v26 }
 0x247   :  { %v1872_v58 = vadd.f32 %v5692_v50, %v1841_v59  ;;  %v5790_v6 = vpop.f32.mrf.mxu0 }
 0x248   :  { %3196 = vmatpush.msra.mxu1 %v3195_v16 }
 0x249   :  { %3011 = vmatmul.f32.vlgmr.msra.gmra.mxu3 %v5552_v7  ;;  %v1903_v41 = vadd.f32 %v5698_v10, %v1872_v58  ;;  %v2027_v10 = vadd.f32 %v5708_v0, %v5700_v31 }
 0x24a   :  { %2980 = vmatmul.f32.gmra.mxu2 %v5609_v15  ;;  %3258 = vmatpush.msra.mxu3 %v3156_v33 }
 0x24b   :  { %3202 = vmatpush.msra.mxu1 %v3201_v40  ;;  %3173 = vmatmul.f32.gmra.mxu0 %v5609_v15 }
 0x24c   :  { %3204 = vmatmul.f32.vlgmr.msra.gmra.mxu1 %v5552_v7  ;;  %v1956_v43 = vpop.f32.mrf.mxu3  ;;  %3260 = vmatpush.msra.mxu3 %v3158_v1  ;;  %v5801_v60 = vpop.f32.mrf.mxu1 }
 0x24d   :  { %v1933_v28 = vpop.f32.mrf.mxu2  ;;  %3320 = vmatpush.msrb.mxu1 %v3156_v33  ;;  %v1957_v30 = vadd.f32 %v1956_v43, %v1930_v57 }
 0x24e   :  { %v1934_v35 = vadd.f32 %v1933_v28, %v1903_v41 }
 0x24f   :  { %3322 = vmatpush.msrb.mxu1 %v3158_v1  ;;  %v2353_v3 = vmul.f32 %v1957_v30, %v5528_v44  ;;  %v5804_v55 = vpop.f32.mrf.mxu0 }
 0x251   :  { %3015 = vmatmul.f32.gmra.mxu3 %v5586_v45  ;;  %v3351_v42 = vand.u32 4294901760, %v2353_v3 }
 0x252   :  { %3104 = vmatmul.f32.vlgmr.msrb.gmra.mxu2 %v5552_v7 }
 0x253   :  { %3297 = vmatmul.f32.vlgmr.msrb.gmra.mxu0 %v5552_v7  ;;  %v3391_v52 = vsub.f32 %v2353_v3, %v3351_v42 }
 0x254   :  { %3208 = vmatmul.f32.gmra.mxu1 %v5586_v45  ;;  %v1960_v50 = vpop.f32.mrf.mxu3  ;;  %v5813_v43 = vpop.f32.mrf.mxu1 }
 0x255   :  { %v2056_v29 = vpop.f32.mrf.mxu2  ;;  %v1961_v21 = vadd.f32 %v1960_v50, %v1934_v35  ;;  %v3392_v31 = vand.u32 4294901760, %v3391_v52 }
 0x256   :  { %v2057_v36 = vadd.f32 %v2056_v29, %v2027_v10 }
 0x257   :  { %v2354_v39 = vmul.f32 %v1961_v21, %v5537_v17  ;;  %v3393_v33 = vsub.f32 %v3391_v52, %v3392_v31  ;;  %v5817_v58 = vpop.f32.mrf.mxu0 }
 0x259   :  { %v3333_v13 = vsel %vm2366_vm1, %v2354_v39, 0  ;;  %3131 = vmatmul.f32.vlgmr.msrb.gmra.mxu3 %v5552_v7  ;;  %v3394_v5 = vand.u32 4294901760, %v3393_v33 }
 0x25a   :  { %3108 = vmatmul.f32.gmra.mxu2 %v5586_v45  ;;  %v3349_v11 = vand.u32 4294901760, %v3333_v13 }
 0x25b   :  { %3301 = vmatmul.f32.gmra.mxu0 %v5586_v45 }
 0x25c   :  { %3324 = vmatmul.f32.vlgmr.msrb.gmra.mxu1 %v5552_v7  ;;  %v3385_v56 = vsub.f32 %v3333_v13, %v3349_v11  ;;  %v2086_v1 = vpop.f32.mrf.mxu3  ;;  %3350 = vmatpush.msrb.mxu2 %v3349_v11  ;;  %v5825_v13 = vpop.f32.mrf.mxu1 }
 0x25d   :  { %v2061_v32 = vpop.f32.mrf.mxu2  ;;  %3451 = vmatpush.msra.mxu1 %v3349_v11  ;;  %v2087_v0 = vadd.f32 %v2086_v1, %v2057_v36 }
 0x25e   :  { %3352 = vmatpush.msrb.mxu2 %v3351_v42  ;;  %v3386_v47 = vand.u32 4294901760, %v3385_v56  ;;  %3421 = vmatpush.msra.mxu0 %v3385_v56  ;;  %v2062_v53 = vadd.f32 %v2061_v32, %v2031_v46  ;;  %v141_v32 = vld [vmem:[#allocation10 + $0x8] sm:$0xf] }
 0x25f   :  { %v2120_v9 = vadd.f32 %v5728_v18, %v2087_v0  ;;  %3453 = vmatpush.msra.mxu1 %v3351_v42 }
 0x260   :  { %v3387_v38 = vsub.f32 %v3385_v56, %v3386_v47  ;;  %3424 = vmatpush.msra.mxu0 %v3391_v52 }
 0x261   :  { %3135 = vmatmul.f32.gmra.mxu3 %v5586_v45  ;;  %v2147_v48 = vadd.f32 %v5738_v61, %v2120_v9  ;;  %v140_v9 = vld [vmem:[#allocation10] sm:$0xff] }
 0x262   :  { %3234 = vmatmul.f32.vlgmr.msra.gmra.mxu2 %v5565_v23  ;;  %v3388_v8 = vand.u32 4294901760, %v3387_v38  ;;  %v5842_v33 = vand.u32 4294901760, %v140_v9 }
 0x263   :  { %3484 = vmatpush.msra.mxu2 %v3386_v47  ;;  %3427 = vmatmul.f32.vlgmr.msra.gmra.mxu0 %v5565_v23  ;;  %v2355_v51 = vmul.f32 %v2147_v48, %v5528_v44 }
 0x264   :  { %3328 = vmatmul.f32.gmra.mxu1 %v5586_v45  ;;  %v2092_v27 = vpop.f32.mrf.mxu3  ;;  %3389 = vmatpush.msrb.mxu3 %v3388_v8 }
 0x265   :  { %v2177_v18 = vpop.f32.mrf.mxu2  ;;  %3488 = vmatpush.msra.mxu2 %v3392_v31  ;;  %v2093_v62 = vadd.f32 %v2092_v27, %v2062_v53  ;;  %v3544_v2 = vand.u32 4294901760, %v2355_v51  ;;  %v3960_v31 = vsel %vm2366_vm1, %v141_v32, 0  ;;  %v5852_v27 = vsub.f32 %v140_v9, %v5842_v33 }
 0x266   :  { %3395 = vmatpush.msrb.mxu3 %v3394_v5  ;;  %v5834_v47 = vand.u32 4294901760, %v3960_v31 }
 0x267   :  { %v2124_v61 = vadd.f32 %v5741_v63, %v2093_v62  ;;  %v3584_v63 = vsub.f32 %v2355_v51, %v3544_v2  ;;  %v4131_v5 = vand.u32 4294901760, %v5852_v27 }
 0x268   :  { %v5840_v38 = vsub.f32 %v3960_v31, %v5834_v47 }
 0x269   :  { %3264 = vmatmul.f32.vlgmr.msra.gmra.mxu3 %v5570_v37  ;;  %v2151_v25 = vadd.f32 %v5751_v19, %v2124_v61  ;;  %v3585_v30 = vand.u32 4294901760, %v3584_v63  ;;  %v2434_v61 = vadd.f32 %v5788_v24, %v5778_v49 }
 0x26a   :  { %3239 = vmatmul.f32.gmra.mxu2 %v5592_v22  ;;  %3513 = vmatpush.msra.mxu3 %v3349_v11  ;;  %v4125_v53 = vand.u32 4294901760, %v5840_v38 }
 0x26b   :  { %v2356_v16 = vmul.f32 %v2151_v25, %v5537_v17  ;;  %3432 = vmatmul.f32.gmra.mxu0 %v5592_v22  ;;  %v3586_v50 = vsub.f32 %v3584_v63, %v3585_v30 }
 0x26c   :  { %3457 = vmatmul.f32.vlgmr.msra.gmra.mxu1 %v5570_v37  ;;  %v2216_v40 = vpop.f32.mrf.mxu3  ;;  %3515 = vmatpush.msra.mxu3 %v3351_v42  ;;  %v5845_v48 = vpop.f32.mrf.mxu1  ;;  %v4126_v25 = vsub.f32 %v5840_v38, %v4125_v53 }
 0x26d   :  { %v2185_v59 = vpop.f32.mrf.mxu2  ;;  %v3526_v26 = vsel %vm2366_vm1, %v2356_v16, 0  ;;  %v2217_v19 = vadd.f32 %v2216_v40, %v2177_v18  ;;  %v3587_v39 = vand.u32 4294901760, %v3586_v50 }
 0x26e   :  { %v3542_v57 = vand.u32 4294901760, %v3526_v26 }
 0x26f   :  { %v2247_v29 = vadd.f32 %v5753_v54, %v2217_v19  ;;  %v5829_v54 = vpop.f32.mrf.mxu0 }
 0x270   :  { %v3578_v28 = vsub.f32 %v3526_v26, %v3542_v57  ;;  %3543 = vmatpush.msrb.mxu0 %v3542_v57 }
 0x271   :  { %3270 = vmatmul.f32.gmra.mxu3 %v5597_v20  ;;  %v2277_v52 = vadd.f32 %v5760_v14, %v2247_v29 }
 0x272   :  { %3358 = vmatmul.f32.vlgmr.msrb.gmra.mxu2 %v5584_v34  ;;  %3545 = vmatpush.msrb.mxu0 %v3544_v2  ;;  %v3579_v3 = vand.u32 4294901760, %v3578_v28 }
 0x273   :  { %3614 = vmatpush.msrb.mxu2 %v3578_v28  ;;  %3551 = vmatmul.f32.vlgmr.msrb.gmra.mxu0 %v5584_v34 }
 0x274   :  { %3463 = vmatmul.f32.gmra.mxu1 %v5597_v20  ;;  %v2220_v41 = vpop.f32.mrf.mxu3  ;;  %v3580_v42 = vsub.f32 %v3578_v28, %v3579_v3  ;;  %3677 = vmatpush.msra.mxu0 %v3579_v3  ;;  %v5871_v19 = vpop.f32.mrf.mxu1 }
 0x275   :  { %v2309_v35 = vpop.f32.mrf.mxu2  ;;  %3617 = vmatpush.msrb.mxu2 %v3584_v63  ;;  %v2221_v10 = vadd.f32 %v2220_v41, %v2185_v59  ;;  %v4132_v59 = vsub.f32 %v5852_v27, %v4131_v5  ;;  %v2438_v41 = vadd.f32 %v5801_v60, %v5790_v6 }
 0x276   :  { %v3581_v21 = vand.u32 4294901760, %v3580_v42  ;;  %3681 = vmatpush.msra.mxu0 %v3585_v30  ;;  %v2310_v11 = vadd.f32 %v2309_v35, %v2277_v52 }
 0x277   :  { %v2252_v1 = vadd.f32 %v5765_v4, %v2221_v10  ;;  %v5854_v18 = vpop.f32.mrf.mxu0  ;;  %v4133_v3 = vand.u32 4294901760, %v4132_v59 }
 0x278   :  { %3582 = vmatpush.msrb.mxu1 %v3581_v21 }
 0x279   :  { %3397 = vmatmul.f32.vlgmr.msrb.gmra.mxu3 %v5552_v7  ;;  %v2283_v46 = vadd.f32 %v5774_v12, %v2252_v1 }
 0x27a   :  { %3366 = vmatmul.f32.gmra.mxu2 %v5609_v15  ;;  %3644 = vmatpush.msrb.mxu3 %v3542_v57 }
 0x27b   :  { %3588 = vmatpush.msrb.mxu1 %v3587_v39  ;;  %3559 = vmatmul.f32.gmra.mxu0 %v5609_v15 }
 0x27c   :  { %3590 = vmatmul.f32.vlgmr.msrb.gmra.mxu1 %v5552_v7  ;;  %v2336_v36 = vpop.f32.mrf.mxu3  ;;  %3646 = vmatpush.msrb.mxu3 %v3544_v2 }
 0x27d   :  { %v2313_v56 = vpop.f32.mrf.mxu2  ;;  %3706 = vmatpush.msra.mxu1 %v3542_v57  ;;  %v2337_v14 = vadd.f32 %v2336_v36, %v2310_v11  ;;  %v4127_v57 = vand.u32 4294901760, %v4126_v25 }
 0x27e   :  { %v2314_v4 = vadd.f32 %v2313_v56, %v2283_v46 }
 0x27f   :  { %3708 = vmatpush.msra.mxu1 %v3544_v2  ;;  %v2357_v0 = vmul.f32 %v2337_v14, %v5528_v44 }
 0x281   :  { %3401 = vmatmul.f32.gmra.mxu3 %v5586_v45  ;;  %v5848_v44 = vand.u32 4294901760, %v2357_v0 }
 0x282   :  { %3490 = vmatmul.f32.vlgmr.msra.gmra.mxu2 %v5552_v7 }
 0x283   :  { %3683 = vmatmul.f32.vlgmr.msra.gmra.mxu0 %v5552_v7  ;;  %v3777_v2 = vsub.f32 %v2357_v0, %v5848_v44 }
 0x284   :  { %3594 = vmatmul.f32.gmra.mxu1 %v5586_v45  ;;  %v2340_v12 = vpop.f32.mrf.mxu3 }
 0x285   :  { %v2463_v8 = vpop.f32.mrf.mxu2  ;;  %v2341_v51 = vadd.f32 %v2340_v12, %v2314_v4  ;;  %v3778_v26 = vand.u32 4294901760, %v3777_v2 }
 0x286   :  { %v2464_v63 = vadd.f32 %v2463_v8, %v2434_v61 }
 0x287   :  { %v2358_v62 = vmul.f32 %v2341_v51, %v5537_v17  ;;  %v3779_v50 = vsub.f32 %v3777_v2, %v3778_v26 }
 0x289   :  { %v3719_v16 = vsel %vm2366_vm1, %v2358_v62, 0  ;;  %3517 = vmatmul.f32.vlgmr.msra.gmra.mxu3 %v5552_v7  ;;  %v3780_v11 = vand.u32 4294901760, %v3779_v50 }
 0x28a   :  { %3494 = vmatmul.f32.gmra.mxu2 %v5586_v45  ;;  %v3735_v40 = vand.u32 4294901760, %v3719_v16 }
 0x28b   :  { %3687 = vmatmul.f32.gmra.mxu0 %v5586_v45 }
 0x28c   :  { %3710 = vmatmul.f32.vlgmr.msra.gmra.mxu1 %v5552_v7  ;;  %v3771_v17 = vsub.f32 %v3719_v16, %v3735_v40  ;;  %v2493_v49 = vpop.f32.mrf.mxu3  ;;  %3736 = vmatpush.msra.mxu2 %v3735_v40 }
 0x28d   :  { %v2468_v24 = vpop.f32.mrf.mxu2  ;;  %3837 = vmatpush.msrb.mxu1 %v3735_v40  ;;  %v2494_v28 = vadd.f32 %v2493_v49, %v2464_v63 }
 0x28e   :  { %3738 = vmatpush.msra.mxu2 %v5848_v44  ;;  %v3772_v30 = vand.u32 4294901760, %v3771_v17  ;;  %3807 = vmatpush.msrb.mxu0 %v3771_v17  ;;  %v2469_v6 = vadd.f32 %v2468_v24, %v2438_v41 }
 0x28f   :  { %v2527_v35 = vadd.f32 %v5804_v55, %v2494_v28  ;;  %3839 = vmatpush.msrb.mxu1 %v5848_v44 }
 0x290   :  { %v3773_v42 = vsub.f32 %v3771_v17, %v3772_v30  ;;  %v5877_v29 = vpop.f32.mrf.mxu0  ;;  %3810 = vmatpush.msrb.mxu0 %v3777_v2 }
 0x291   :  { %4128 = vmatpush.msra.mxu1 %v4127_v57  ;;  %3521 = vmatmul.f32.gmra.mxu3 %v5586_v45  ;;  %v2554_v21 = vadd.f32 %v5813_v43, %v2527_v35 }
 0x292   :  { %3620 = vmatmul.f32.vlgmr.msrb.gmra.mxu2 %v5565_v23  ;;  %v3774_v39 = vand.u32 4294901760, %v3773_v42  ;;  %3977 = vmatpush.msra.mxu0 %v5834_v47 }
 0x293   :  { %3870 = vmatpush.msrb.mxu2 %v3772_v30  ;;  %4134 = vmatpush.msra.mxu1 %v4133_v3  ;;  %v3912_v60 = vsel %vm2359_vm2, %v2554_v21, 0 }
 0x294   :  { %3714 = vmatmul.f32.gmra.mxu1 %v5586_v45  ;;  %3813 = vmatmul.f32.vlgmr.msrb.gmra.mxu0 %v5565_v23  ;;  %v2499_v55 = vpop.f32.mrf.mxu3  ;;  %v5885_v10 = vand.u32 4294901760, %v3912_v60 }
 0x295   :  { %v2587_v52 = vpop.f32.mrf.mxu2  ;;  %3775 = vmatpush.msra.mxu3 %v3774_v39  ;;  %3874 = vmatpush.msrb.mxu2 %v3778_v26  ;;  %v2500_v36 = vadd.f32 %v2499_v55, %v2469_v6 }
 0x296   :  { %v5889_v43 = vsub.f32 %v3912_v60, %v5885_v10  ;;  %3979 = vmatpush.msra.mxu0 %v5842_v33 }
 0x297   :  { %3781 = vmatpush.msra.mxu3 %v3780_v11  ;;  %v2531_v56 = vadd.f32 %v5817_v58, %v2500_v36 }
 0x298   :  { %v5895_v23 = vpop.f32.mrf.mxu0  ;;  %4433 = vmatpush.msrb.mxu0 %v4125_v53  ;;  %v3982_v1 = vand.u32 4294901760, %v5889_v43 }
 0x299   :  { %v5893_v14 = vpop.f32.mrf.mxu1  ;;  %3650 = vmatmul.f32.vlgmr.msrb.gmra.mxu3 %v5570_v37  ;;  %v2558_v32 = vadd.f32 %v5825_v13, %v2531_v56 }
 0x29a   :  { %3625 = vmatmul.f32.gmra.mxu2 %v5592_v22  ;;  %3899 = vmatpush.msrb.mxu3 %v3735_v40  ;;  %v3983_v13 = vsub.f32 %v5889_v43, %v3982_v1  ;;  %v2820_v28 = vadd.f32 %v5893_v14, %v5877_v29 }
 0x29b   :  { %4437 = vmatpush.msrb.mxu0 %v4131_v5  ;;  %v3915_v58 = vsel %vm2359_vm2, %v2558_v32, 0 }
 0x29c   :  { %3843 = vmatmul.f32.vlgmr.msrb.gmra.mxu1 %v5570_v37  ;;  %3818 = vmatmul.f32.gmra.mxu0 %v5592_v22  ;;  %v2626_v31 = vpop.f32.mrf.mxu3  ;;  %v5906_v0 = vand.u32 4294901760, %v3915_v58  ;;  %v3984_v4 = vand.u32 4294901760, %v3983_v13 }
 0x29d   :  { %v2595_v46 = vpop.f32.mrf.mxu2  ;;  %3901 = vmatpush.msrb.mxu3 %v5848_v44  ;;  %4518 = vmatpush.msrb.mxu1 %v5834_v47  ;;  %v2627_v12 = vadd.f32 %v2626_v31, %v2587_v52 }
 0x29e   :  { %v5914_v9 = vsub.f32 %v3915_v58, %v5906_v0 }
 0x29f   :  { %4520 = vmatpush.msrb.mxu1 %v5842_v33  ;;  %v2657_v51 = vadd.f32 %v5829_v54, %v2627_v12 }
 0x2a0   :  { %v5919_v22 = vpop.f32.mrf.mxu0  ;;  %v3990_v44 = vand.u32 4294901760, %v5914_v9 }
 0x2a1   :  { %v5917_v37 = vpop.f32.mrf.mxu1  ;;  %3656 = vmatmul.f32.gmra.mxu3 %v5597_v20  ;;  %v2687_v2 = vadd.f32 %v5845_v48, %v2657_v51 }
 0x2a2   :  { %3744 = vmatmul.f32.vlgmr.msra.gmra.mxu2 %v5584_v34  ;;  %v3991_v5 = vsub.f32 %v5914_v9, %v3990_v44 }
 0x2a3   :  { %4216 = vmatpush.msra.mxu2 %v5840_v38 }
 0x2a4   :  { %3849 = vmatmul.f32.gmra.mxu1 %v5597_v20  ;;  %3985 = vmatmul.f32.vlgmr.msra.gmra.mxu0 %v3984_v4  ;;  %v2630_v8 = vpop.f32.mrf.mxu3  ;;  %v3992_v20 = vand.u32 4294901760, %v3991_v5 }
 0x2a5   :  { %v2719_v53 = vpop.f32.mrf.mxu2  ;;  %4219 = vmatpush.msra.mxu2 %v5852_v27  ;;  %v2631_v34 = vadd.f32 %v2630_v8, %v2595_v46 }
 0x2a6   :  { %v2720_v38 = vadd.f32 %v2719_v53, %v2687_v2 }
 0x2a7   :  { %v2662_v16 = vadd.f32 %v5854_v18, %v2631_v34 }
 0x2a8   :  { %v5931_v61 = vpop.f32.mrf.mxu0 }
 0x2a9   :  { %v2939_v62 = vpop.f32.mrf.mxu1  ;;  %3783 = vmatmul.f32.vlgmr.msra.gmra.mxu3 %v5552_v7 }
 0x2aa   :  { %3752 = vmatmul.f32.gmra.mxu2 %v5609_v15  ;;  %4316 = vmatpush.msra.mxu3 %v5834_v47  ;;  %v2693_v47 = vadd.f32 %v5871_v19, %v2662_v16 }
 0x2ac   :  { %4136 = vmatmul.f32.vlgmr.msra.gmra.mxu1 %v5885_v10  ;;  %3993 = vmatmul.f32.gmra.mxu0 %v3992_v20  ;;  %v2746_v54 = vpop.f32.mrf.mxu3 }
 0x2ad   :  { %v2723_v27 = vpop.f32.mrf.mxu2  ;;  %4318 = vmatpush.msra.mxu3 %v5842_v33  ;;  %v2747_v25 = vadd.f32 %v2746_v54, %v2720_v38 }
 0x2ae   :  { %v2724_v33 = vadd.f32 %v2723_v27, %v2693_v47 }
 0x2af   :  { %v3918_v48 = vsel %vm2359_vm2, %v2747_v25, 0 }
 0x2b0   :  { %v5941_v40 = vand.u32 4294901760, %v3918_v48  ;;  %v5943_v15 = vpop.f32.mrf.mxu0 }
 0x2b1   :  { %v2943_v59 = vpop.f32.mrf.mxu1  ;;  %3787 = vmatmul.f32.gmra.mxu3 %v5586_v45 }
 0x2b2   :  { %3876 = vmatmul.f32.vlgmr.msrb.gmra.mxu2 %v5552_v7  ;;  %v5949_v63 = vsub.f32 %v3918_v48, %v5941_v40 }
 0x2b4   :  { %4140 = vmatmul.f32.gmra.mxu1 %v5906_v0  ;;  %v2750_v18 = vpop.f32.mrf.mxu3  ;;  %v3998_v49 = vand.u32 4294901760, %v5949_v63 }
 0x2b5   :  { %v2849_v17 = vpop.f32.mrf.mxu2  ;;  %v2751_v24 = vadd.f32 %v2750_v18, %v2724_v33 }
 0x2b6   :  { %v3999_v26 = vsub.f32 %v5949_v63, %v3998_v49  ;;  %v2850_v42 = vadd.f32 %v2849_v17, %v2820_v28 }
 0x2b7   :  { %v3921_v57 = vsel %vm2359_vm2, %v2751_v24, 0 }
 0x2b8   :  { %v5959_v30 = vand.u32 4294901760, %v3921_v57  ;;  %v5961_v3 = vpop.f32.mrf.mxu0  ;;  %v4000_v41 = vand.u32 4294901760, %v3999_v26 }
 0x2b9   :  { %v3072_v19 = vpop.f32.mrf.mxu1  ;;  %3903 = vmatmul.f32.vlgmr.msrb.gmra.mxu3 %v5552_v7  ;;  %v2824_v7 = vadd.f32 %v5917_v37, %v5895_v23 }
 0x2ba   :  { %3880 = vmatmul.f32.gmra.mxu2 %v5586_v45  ;;  %v5966_v35 = vsub.f32 %v3921_v57, %v5959_v30  ;;  %4001 = vmatmul.f32.gmra.mxu0 %v4000_v41 }
 0x2bc   :  { %4144 = vmatmul.f32.gmra.mxu1 %v5941_v40  ;;  %v2879_v50 = vpop.f32.mrf.mxu3  ;;  %v4006_v29 = vand.u32 4294901760, %v5966_v35 }
 0x2bd   :  { %v2854_v21 = vpop.f32.mrf.mxu2  ;;  %v2880_v39 = vadd.f32 %v2879_v50, %v2850_v42 }
 0x2be   :  { %v4007_v6 = vsub.f32 %v5966_v35, %v4006_v29  ;;  %v2855_v56 = vadd.f32 %v2854_v21, %v2824_v7 }
 0x2bf   :  { %v2913_v60 = vadd.f32 %v5919_v22, %v2880_v39 }
 0x2c0   :  { %v5976_v52 = vpop.f32.mrf.mxu0  ;;  %v4008_v11 = vand.u32 4294901760, %v4007_v6 }
 0x2c1   :  { %v3078_v55 = vpop.f32.mrf.mxu1  ;;  %3907 = vmatmul.f32.gmra.mxu3 %v5586_v45  ;;  %v2940_v36 = vadd.f32 %v2939_v62, %v2913_v60 }
 0x2c2   :  { %4222 = vmatmul.f32.vlgmr.msra.gmra.mxu2 %v5889_v43  ;;  %4009 = vmatmul.f32.gmra.mxu0 %v4008_v11 }
 0x2c3   :  { %v3924_v14 = vsel %vm2359_vm2, %v2940_v36, 0 }
 0x2c4   :  { %4148 = vmatmul.f32.gmra.mxu1 %v5959_v30  ;;  %v2885_v32 = vpop.f32.mrf.mxu3  ;;  %v5982_v58 = vand.u32 4294901760, %v3924_v14 }
 0x2c5   :  { %v2973_v23 = vpop.f32.mrf.mxu2  ;;  %v2886_v31 = vadd.f32 %v2885_v32, %v2855_v56 }
 0x2c6   :  { %v4013_v46 = vsub.f32 %v3924_v14, %v5982_v58 }
 0x2c7   :  { %v2917_v13 = vadd.f32 %v5931_v61, %v2886_v31 }
 0x2c8   :  { %v5986_v45 = vpop.f32.mrf.mxu0  ;;  %v4014_v22 = vand.u32 4294901760, %v4013_v46 }
 0x2c9   :  { %v3205_v37 = vpop.f32.mrf.mxu1  ;;  %v2944_v4 = vadd.f32 %v2943_v59, %v2917_v13  ;;  %4322 = vmatmul.f32.vlgmr.msra.gmra.mxu3 %v3982_v1 }
 0x2ca   :  { %4227 = vmatmul.f32.gmra.mxu2 %v5914_v9  ;;  %v4015_v12 = vsub.f32 %v4013_v46, %v4014_v22  ;;  %v3206_v39 = vadd.f32 %v3205_v37, %v5976_v52 }
 0x2cb   :  { %v3927_v8 = vsel %vm2359_vm2, %v2944_v4, 0 }
 0x2cc   :  { %4152 = vmatmul.f32.gmra.mxu1 %v5982_v58  ;;  %v3012_v53 = vpop.f32.mrf.mxu3  ;;  %v5993_v51 = vand.u32 4294901760, %v3927_v8  ;;  %v4016_v62 = vand.u32 4294901760, %v4015_v12 }
 0x2cd   :  { %v2981_v5 = vpop.f32.mrf.mxu2  ;;  %v3013_v1 = vadd.f32 %v3012_v53, %v2973_v23 }
 0x2ce   :  { %v5996_v61 = vsub.f32 %v3927_v8, %v5993_v51  ;;  %4017 = vmatmul.f32.gmra.mxu0 %v4016_v62 }
 0x2cf   :  { %v3043_v25 = vadd.f32 %v5943_v15, %v3013_v1 }
 0x2d0   :  { %v3298_v2 = vpop.f32.mrf.mxu0  ;;  %v4022_v43 = vand.u32 4294901760, %v5996_v61 }
 0x2d1   :  { %v3209_v34 = vpop.f32.mrf.mxu1  ;;  %4328 = vmatmul.f32.gmra.mxu3 %v3990_v44  ;;  %v3073_v59 = vadd.f32 %v3072_v19, %v3043_v25 }
 0x2d2   :  { %4232 = vmatmul.f32.gmra.mxu2 %v5949_v63  ;;  %v4023_v20 = vsub.f32 %v5996_v61, %v4022_v43  ;;  %v3210_v52 = vadd.f32 %v3209_v34, %v5986_v45 }
 0x2d4   :  { %4156 = vmatmul.f32.gmra.mxu1 %v5993_v51  ;;  %v3016_v38 = vpop.f32.mrf.mxu3  ;;  %v4024_v27 = vand.u32 4294901760, %v4023_v20 }
 0x2d5   :  { %v3105_v54 = vpop.f32.mrf.mxu2  ;;  %v3017_v48 = vadd.f32 %v3016_v38, %v2981_v5 }
 0x2d6   :  { %4025 = vmatmul.f32.gmra.mxu0 %v4024_v27  ;;  %v3106_v9 = vadd.f32 %v3105_v54, %v3073_v59 }
 0x2d7   :  { %v3048_v17 = vadd.f32 %v5961_v3, %v3017_v48 }
 0x2d8   :  { %v3302_v47 = vpop.f32.mrf.mxu0 }
 0x2d9   :  { %v3325_v16 = vpop.f32.mrf.mxu1  ;;  %4334 = vmatmul.f32.gmra.mxu3 %v3998_v49  ;;  %v3079_v57 = vadd.f32 %v3078_v55, %v3048_v17 }
 0x2da   :  { %4237 = vmatmul.f32.gmra.mxu2 %v5966_v35 }
 0x2dc   :  { %v3132_v44 = vpop.f32.mrf.mxu3 }
 0x2dd   :  { %v3109_v33 = vpop.f32.mrf.mxu2  ;;  %v3133_v18 = vadd.f32 %v3132_v44, %v3106_v9 }
 0x2de   :  { %v3110_v49 = vadd.f32 %v3109_v33, %v3079_v57 }
 0x2df   :  { %v3930_v24 = vsel %vm2359_vm2, %v3133_v18, 0 }
 0x2e0   :  { %v6010_v26 = vand.u32 4294901760, %v3930_v24  ;;  %v6016_v28 = vpop.f32.mrf.mxu0 }
 0x2e1   :  { %v3329_v15 = vpop.f32.mrf.mxu1  ;;  %4340 = vmatmul.f32.gmra.mxu3 %v4006_v29 }
 0x2e2   :  { %4242 = vmatmul.f32.gmra.mxu2 %v4013_v46  ;;  %v4029_v63 = vsub.f32 %v3930_v24, %v6010_v26  ;;  %4160 = vmatmul.f32.gmra.mxu1 %v6010_v26 }
 0x2e4   :  { %v3136_v19 = vpop.f32.mrf.mxu3  ;;  %v4030_v3 = vand.u32 4294901760, %v4029_v63 }
 0x2e5   :  { %v3235_v41 = vpop.f32.mrf.mxu2  ;;  %v3137_v42 = vadd.f32 %v3136_v19, %v3110_v49 }
 0x2e6   :  { %v4031_v50 = vsub.f32 %v4029_v63, %v4030_v3  ;;  %v3236_v60 = vadd.f32 %v3235_v41, %v3206_v39 }
 0x2e7   :  { %v3933_v21 = vsel %vm2359_vm2, %v3137_v42, 0 }
 0x2e8   :  { %v6020_v6 = vand.u32 4294901760, %v3933_v21  ;;  %v4032_v29 = vand.u32 4294901760, %v4031_v50  ;;  %v3433_v14 = vpop.f32.mrf.mxu0 }
 0x2e9   :  { %v3458_v35 = vpop.f32.mrf.mxu1  ;;  %4346 = vmatmul.f32.gmra.mxu3 %v4014_v22 }
 0x2ea   :  { %4247 = vmatmul.f32.gmra.mxu2 %v5996_v61  ;;  %v4037_v7 = vsub.f32 %v3933_v21, %v6020_v6  ;;  %4033 = vmatmul.f32.gmra.mxu0 %v4032_v29 }
 0x2eb   :  { %4164 = vmatmul.f32.gmra.mxu1 %v6020_v6 }
 0x2ec   :  { %v3265_v55 = vpop.f32.mrf.mxu3  ;;  %v4038_v36 = vand.u32 4294901760, %v4037_v7 }
 0x2ed   :  { %v3240_v11 = vpop.f32.mrf.mxu2  ;;  %v3266_v56 = vadd.f32 %v3265_v55, %v3236_v60 }
 0x2ee   :  { %v4039_v32 = vsub.f32 %v4037_v7, %v4038_v36  ;;  %v3241_v37 = vadd.f32 %v3240_v11, %v3210_v52 }
 0x2ef   :  { %v3299_v23 = vadd.f32 %v3298_v2, %v3266_v56 }
 0x2f0   :  { %v4040_v46 = vand.u32 4294901760, %v4039_v32  ;;  %v3552_v62 = vpop.f32.mrf.mxu0 }
 0x2f1   :  { %v3464_v31 = vpop.f32.mrf.mxu1  ;;  %v3326_v13 = vadd.f32 %v3325_v16, %v3299_v23  ;;  %4352 = vmatmul.f32.gmra.mxu3 %v4022_v43 }
 0x2f2   :  { %4252 = vmatmul.f32.gmra.mxu2 %v4029_v63  ;;  %4041 = vmatmul.f32.gmra.mxu0 %v4040_v46 }
 0x2f3   :  { %v3936_v22 = vsel %vm2359_vm2, %v3326_v13, 0 }
 0x2f4   :  { %v3271_v4 = vpop.f32.mrf.mxu3  ;;  %v6027_v12 = vand.u32 4294901760, %v3936_v22 }
 0x2f5   :  { %v3359_v8 = vpop.f32.mrf.mxu2  ;;  %v3272_v53 = vadd.f32 %v3271_v4, %v3241_v37 }
 0x2f6   :  { %v4045_v5 = vsub.f32 %v3936_v22, %v6027_v12  ;;  %4168 = vmatmul.f32.gmra.mxu1 %v6027_v12 }
 0x2f7   :  { %v3303_v45 = vadd.f32 %v3302_v47, %v3272_v53 }
 0x2f8   :  { %v4046_v34 = vand.u32 4294901760, %v4045_v5  ;;  %v3560_v47 = vpop.f32.mrf.mxu0 }
 0x2f9   :  { %v3591_v61 = vpop.f32.mrf.mxu1  ;;  %v3330_v2 = vadd.f32 %v3329_v15, %v3303_v45  ;;  %4358 = vmatmul.f32.gmra.mxu3 %v4030_v3 }
 0x2fa   :  { %4257 = vmatmul.f32.gmra.mxu2 %v4037_v7  ;;  %v4047_v43 = vsub.f32 %v4045_v5, %v4046_v34  ;;  %v3592_v32 = vadd.f32 %v3591_v61, %v3552_v62 }
 0x2fb   :  { %v3939_v1 = vsel %vm2359_vm2, %v3330_v2, 0 }
 0x2fc   :  { %v3398_v20 = vpop.f32.mrf.mxu3  ;;  %v6032_v38 = vand.u32 4294901760, %v3939_v1  ;;  %v4048_v27 = vand.u32 4294901760, %v4047_v43 }
 0x2fd   :  { %v3367_v54 = vpop.f32.mrf.mxu2  ;;  %v3399_v59 = vadd.f32 %v3398_v20, %v3359_v8 }
 0x2fe   :  { %v4053_v25 = vsub.f32 %v3939_v1, %v6032_v38  ;;  %4049 = vmatmul.f32.gmra.mxu0 %v4048_v27  ;;  %4172 = vmatmul.f32.gmra.mxu1 %v6032_v38 }
 0x2ff   :  { %v3429_v17 = vadd.f32 %v6016_v28, %v3399_v59 }
 0x300   :  { %v4054_v48 = vand.u32 4294901760, %v4053_v25  ;;  %v3684_v49 = vpop.f32.mrf.mxu0 }
 0x301   :  { %v3595_v16 = vpop.f32.mrf.mxu1  ;;  %4364 = vmatmul.f32.gmra.mxu3 %v4038_v36  ;;  %v3459_v57 = vadd.f32 %v3458_v35, %v3429_v17 }
 0x302   :  { %4262 = vmatmul.f32.gmra.mxu2 %v4045_v5  ;;  %v4055_v9 = vsub.f32 %v4053_v25, %v4054_v48  ;;  %v3596_v5 = vadd.f32 %v3595_v16, %v3560_v47 }
 0x304   :  { %v3402_v44 = vpop.f32.mrf.mxu3  ;;  %v4056_v18 = vand.u32 4294901760, %v4055_v9 }
 0x305   :  { %v3491_v33 = vpop.f32.mrf.mxu2  ;;  %v3403_v15 = vadd.f32 %v3402_v44, %v3367_v54 }
 0x306   :  { %4057 = vmatmul.f32.gmra.mxu0 %v4056_v18  ;;  %v3492_v63 = vadd.f32 %v3491_v33, %v3459_v57 }
 0x307   :  { %v3434_v42 = vadd.f32 %v3433_v14, %v3403_v15 }
 0x308   :  { %v3688_v36 = vpop.f32.mrf.mxu0 }
 0x309   :  { %v3711_v24 = vpop.f32.mrf.mxu1  ;;  %4370 = vmatmul.f32.gmra.mxu3 %v4046_v34  ;;  %v3465_v29 = vadd.f32 %v3464_v31, %v3434_v42 }
 0x30a   :  { %4267 = vmatmul.f32.gmra.mxu2 %v4053_v25 }
 0x30c   :  { %v3518_v19 = vpop.f32.mrf.mxu3 }
 0x30d   :  { %v3495_v41 = vpop.f32.mrf.mxu2  ;;  %v3519_v3 = vadd.f32 %v3518_v19, %v3492_v63 }
 0x30e   :  { %v3496_v35 = vadd.f32 %v3495_v41, %v3465_v29 }
 0x30f   :  { %v3942_v50 = vsel %vm2359_vm2, %v3519_v3, 0 }
 0x310   :  { %v6038_v21 = vand.u32 4294901760, %v3942_v50 }
 0x311   :  { %v3715_v39 = vpop.f32.mrf.mxu1  ;;  %4376 = vmatmul.f32.gmra.mxu3 %v4054_v48  ;;  %v3814_v62 = vpop.f32.mrf.mxu0 }
 0x312   :  { %v4061_v28 = vsub.f32 %v3942_v50, %v6038_v21  ;;  %4176 = vmatmul.f32.gmra.mxu1 %v6038_v21 }
 0x314   :  { %v3522_v7 = vpop.f32.mrf.mxu3  ;;  %v4062_v55 = vand.u32 4294901760, %v4061_v28  ;;  %4272 = vmatmul.f32.gmra.mxu2 %v4061_v28 }
 0x315   :  { %v3621_v60 = vpop.f32.mrf.mxu2  ;;  %v3523_v11 = vadd.f32 %v3522_v7, %v3496_v35 }
 0x316   :  { %v4063_v56 = vsub.f32 %v4061_v28, %v4062_v55  ;;  %v3622_v13 = vadd.f32 %v3621_v60, %v3592_v32 }
 0x317   :  { %v3945_v14 = vsel %vm2359_vm2, %v3523_v11, 0 }
 0x318   :  { %v6043_v52 = vand.u32 4294901760, %v3945_v14  ;;  %v4064_v23 = vand.u32 4294901760, %v4063_v56 }
 0x319   :  { %v3844_v31 = vpop.f32.mrf.mxu1  ;;  %4382 = vmatmul.f32.gmra.mxu3 %v4062_v55  ;;  %v3819_v9 = vpop.f32.mrf.mxu0 }
 0x31a   :  { %v4069_v46 = vsub.f32 %v3945_v14, %v6043_v52  ;;  %4065 = vmatmul.f32.gmra.mxu0 %v4064_v23  ;;  %4180 = vmatmul.f32.gmra.mxu1 %v6043_v52 }
 0x31c   :  { %v3651_v37 = vpop.f32.mrf.mxu3  ;;  %v4070_v4 = vand.u32 4294901760, %v4069_v46  ;;  %4277 = vmatmul.f32.gmra.mxu2 %v4069_v46 }
 0x31d   :  { %v3626_v22 = vpop.f32.mrf.mxu2  ;;  %v3652_v8 = vadd.f32 %v3651_v37, %v3622_v13 }
 0x31e   :  { %v4071_v53 = vsub.f32 %v4069_v46, %v4070_v4  ;;  %v3627_v2 = vadd.f32 %v3626_v22, %v3596_v5 }
 0x31f   :  { %v3685_v45 = vadd.f32 %v3684_v49, %v3652_v8 }
 0x320   :  { %v4072_v61 = vand.u32 4294901760, %v4071_v53 }
 0x321   :  { %v3712_v34 = vadd.f32 %v3711_v24, %v3685_v45  ;;  %4388 = vmatmul.f32.gmra.mxu3 %v4070_v4  ;;  %v3850_v1 = vpop.f32.mrf.mxu1  ;;  %v6059_v3 = vpop.f32.mrf.mxu0 }
 0x322   :  { %4073 = vmatmul.f32.gmra.mxu0 %v4072_v61 }
 0x323   :  { %v3948_v43 = vsel %vm2359_vm2, %v3712_v34, 0 }
 0x324   :  { %v3657_v20 = vpop.f32.mrf.mxu3  ;;  %v6048_v54 = vand.u32 4294901760, %v3948_v43 }
 0x325   :  { %v3745_v27 = vpop.f32.mrf.mxu2  ;;  %v3658_v25 = vadd.f32 %v3657_v20, %v3627_v2 }
 0x326   :  { %v4077_v48 = vsub.f32 %v3948_v43, %v6048_v54  ;;  %4184 = vmatmul.f32.gmra.mxu1 %v6048_v54 }
 0x327   :  { %v3689_v16 = vadd.f32 %v3688_v36, %v3658_v25 }
 0x328   :  { %v4078_v59 = vand.u32 4294901760, %v4077_v48  ;;  %4282 = vmatmul.f32.gmra.mxu2 %v4077_v48 }
 0x329   :  { %v3716_v47 = vadd.f32 %v3715_v39, %v3689_v16  ;;  %v6055_v57 = vpop.f32.mrf.mxu1  ;;  %v6063_v56 = vpop.f32.mrf.mxu0 }
 0x32a   :  { %v4079_v44 = vsub.f32 %v4077_v48, %v4078_v59  ;;  %4394 = vmatmul.f32.gmra.mxu3 %v4078_v59 }
 0x32b   :  { %v3951_v33 = vsel %vm2359_vm2, %v3716_v47, 0 }
 0x32c   :  { %v3784_v18 = vpop.f32.mrf.mxu3  ;;  %v6053_v17 = vand.u32 4294901760, %v3951_v33  ;;  %v4080_v15 = vand.u32 4294901760, %v4079_v44 }
 0x32d   :  { %v3753_v24 = vpop.f32.mrf.mxu2  ;;  %v3785_v19 = vadd.f32 %v3784_v18, %v3745_v27 }
 0x32e   :  { %v4085_v63 = vsub.f32 %v3951_v33, %v6053_v17  ;;  %4081 = vmatmul.f32.gmra.mxu0 %v4080_v15  ;;  %4188 = vmatmul.f32.gmra.mxu1 %v6053_v17 }
 0x32f   :  { %v3815_v39 = vadd.f32 %v3814_v62, %v3785_v19 }
 0x330   :  { %v4086_v49 = vand.u32 4294901760, %v4085_v63  ;;  %4287 = vmatmul.f32.gmra.mxu2 %v4085_v63 }
 0x331   :  { %v6061_v28 = vpop.f32.mrf.mxu1  ;;  %v3845_v7 = vadd.f32 %v3844_v31, %v3815_v39 }
 0x332   :  { %v4087_v41 = vsub.f32 %v4085_v63, %v4086_v49  ;;  %4400 = vmatmul.f32.gmra.mxu3 %v4086_v49 }
 0x334   :  { %v3788_v42 = vpop.f32.mrf.mxu3  ;;  %v4088_v50 = vand.u32 4294901760, %v4087_v41 }
 0x335   :  { %v3877_v29 = vpop.f32.mrf.mxu2  ;;  %v3789_v35 = vadd.f32 %v3788_v42, %v3753_v24 }
 0x336   :  { %4089 = vmatmul.f32.gmra.mxu0 %v4088_v50  ;;  %v3878_v60 = vadd.f32 %v3877_v29, %v3845_v7 }
 0x337   :  { %v3820_v36 = vadd.f32 %v3819_v9, %v3789_v35  ;;  %v6072_v53 = vpop.f32.mrf.mxu0 }
 0x339   :  { %v3851_v46 = vadd.f32 %v3850_v1, %v3820_v36  ;;  %v6068_v13 = vpop.f32.mrf.mxu1 }
 0x33c   :  { %v3904_v55 = vpop.f32.mrf.mxu3 }
 0x33d   :  { %v3905_v11 = vadd.f32 %v3904_v55, %v3878_v60  ;;  %v3881_v23 = vpop.f32.mrf.mxu2 }
 0x33e   :  { %v3882_v22 = vadd.f32 %v3881_v23, %v3851_v46  ;;  %v4138_v23 = vadd.f32 %v6055_v57, %v6059_v3 }
 0x33f   :  { %v3954_v14 = vsel %vm2359_vm2, %v3905_v11, 0  ;;  %v6081_v20 = vpop.f32.mrf.mxu0 }
 0x340   :  { %v6066_v32 = vand.u32 4294901760, %v3954_v14 }
 0x341   :  { %v6079_v2 = vpop.f32.mrf.mxu1 }
 0x342   :  { %v4093_v37 = vsub.f32 %v3954_v14, %v6066_v32  ;;  %4192 = vmatmul.f32.gmra.mxu1 %v6066_v32 }
 0x344   :  { %v3908_v31 = vpop.f32.mrf.mxu3  ;;  %v4094_v4 = vand.u32 4294901760, %v4093_v37  ;;  %4292 = vmatmul.f32.gmra.mxu2 %v4093_v37 }
 0x345   :  { %v3909_v8 = vadd.f32 %v3908_v31, %v3882_v22  ;;  %v4223_v39 = vpop.f32.mrf.mxu2 }
 0x346   :  { %v4095_v5 = vsub.f32 %v4093_v37, %v4094_v4  ;;  %4406 = vmatmul.f32.gmra.mxu3 %v4094_v4 }
 0x347   :  { %v3957_v45 = vsel %vm2359_vm2, %v3909_v8, 0  ;;  %v4142_v8 = vadd.f32 %v6061_v28, %v6063_v56 }
 0x348   :  { %v6075_v62 = vand.u32 4294901760, %v3957_v45  ;;  %v4096_v61 = vand.u32 4294901760, %v4095_v5 }
 0x349   :  { %v6084_v25 = vpop.f32.mrf.mxu1 }
 0x34a   :  { %v4101_v34 = vsub.f32 %v3957_v45, %v6075_v62  ;;  %4097 = vmatmul.f32.gmra.mxu0 %v4096_v61  ;;  %4196 = vmatmul.f32.gmra.mxu1 %v6075_v62  ;;  %v4653_v61 = vld [vmem:[#allocation2] sm:$0xff] }
 0x34b   :  { %v6086_v48 = vpop.f32.mrf.mxu0 }
 0x34c   :  { %v4102_v43 = vand.u32 4294901760, %v4101_v34  ;;  %4297 = vmatmul.f32.gmra.mxu2 %v4101_v34 }
 0x34d   :  { %v4228_v29 = vpop.f32.mrf.mxu2 }
 0x34e   :  { %v4103_v1 = vsub.f32 %v4101_v34, %v4102_v43  ;;  %4412 = vmatmul.f32.gmra.mxu3 %v4102_v43  ;;  %v4229_v45 = vadd.f32 %v4228_v29, %v4142_v8 }
 0x350   :  { %v4104_v27 = vand.u32 4294901760, %v4103_v1 }
 0x351   :  { %v6090_v16 = vpop.f32.mrf.mxu1 }
 0x352   :  { %4105 = vmatmul.f32.gmra.mxu0 %v4104_v27  ;;  %4522 = vmatmul.f32.vlgmr.msrb.gmra.mxu1 %v5885_v10 }
 0x353   :  { %v6092_v59 = vpop.f32.mrf.mxu0 }
 0x355   :  { %v4233_v55 = vpop.f32.mrf.mxu2 }
 0x35a   :  { %4439 = vmatmul.f32.vlgmr.msrb.gmra.mxu0 %v5885_v10  ;;  %4526 = vmatmul.f32.gmra.mxu1 %v5906_v0 }
 0x35d   :  { %v4238_v37 = vpop.f32.mrf.mxu2 }
 0x35f   :  { %v6096_v47 = vpop.f32.mrf.mxu1 }
 0x362   :  { %4443 = vmatmul.f32.gmra.mxu0 %v5906_v0  ;;  %4530 = vmatmul.f32.gmra.mxu1 %v5941_v40 }
 0x367   :  { %v6098_v9 = vpop.f32.mrf.mxu0 }
 0x368   :  { %v6102_v44 = vpop.f32.mrf.mxu1 }
 0x36a   :  { %4447 = vmatmul.f32.gmra.mxu0 %v5941_v40  ;;  %4534 = vmatmul.f32.gmra.mxu1 %v5959_v30 }
 0x36f   :  { %v6106_v10 = vpop.f32.mrf.mxu0 }
 0x372   :  { %4451 = vmatmul.f32.gmra.mxu0 %v5959_v30  ;;  %4538 = vmatmul.f32.gmra.mxu1 %v5982_v58 }
 0x373   :  { %v4169_v33 = vpop.f32.mrf.mxu1 }
 0x37a   :  { %4455 = vmatmul.f32.gmra.mxu0 %v5982_v58  ;;  %4542 = vmatmul.f32.gmra.mxu1 %v5993_v51 }
 0x37b   :  { %v4050_v0 = vpop.f32.mrf.mxu0  ;;  %v4173_v40 = vpop.f32.mrf.mxu1 }
 0x37c   :  { %v6110_v18 = vadd.f32 %v4169_v33, %v4050_v0  ;;  %v4146_v33 = vadd.f32 %v6068_v13, %v6072_v53 }
 0x382   :  { %4459 = vmatmul.f32.gmra.mxu0 %v5993_v51  ;;  %4546 = vmatmul.f32.gmra.mxu1 %v6010_v26 }
 0x383   :  { %v4058_v24 = vpop.f32.mrf.mxu0 }
 0x384   :  { %v6114_v15 = vadd.f32 %v4173_v40, %v4058_v24  ;;  %v4234_v40 = vadd.f32 %v4233_v55, %v4146_v33  ;;  %v4654_v24 = vld [vmem:[#allocation2 + $0x8] sm:$0xff] }
 0x38a   :  { %4463 = vmatmul.f32.gmra.mxu0 %v6010_v26  ;;  %4550 = vmatmul.f32.gmra.mxu1 %v6020_v6 }
 0x38f   :  { %v4177_v30 = vpop.f32.mrf.mxu1 }
 0x392   :  { %4467 = vmatmul.f32.gmra.mxu0 %v6020_v6  ;;  %4554 = vmatmul.f32.gmra.mxu1 %v6027_v12 }
 0x397   :  { %v4066_v58 = vpop.f32.mrf.mxu0  ;;  %v4181_v51 = vpop.f32.mrf.mxu1 }
 0x398   :  { %v6120_v63 = vadd.f32 %v4177_v30, %v4066_v58 }
 0x39a   :  { %4471 = vmatmul.f32.gmra.mxu0 %v6027_v12  ;;  %4558 = vmatmul.f32.gmra.mxu1 %v6032_v38 }
 0x39f   :  { %v4074_v49 = vpop.f32.mrf.mxu0 }
 0x3a0   :  { %v6124_v19 = vadd.f32 %v4181_v51, %v4074_v49  ;;  %v4150_v49 = vadd.f32 %v6079_v2, %v6081_v20  ;;  %v4656_v2 = vld [vmem:[#allocation2 + $0x18] sm:$0xff] }
 0x3a2   :  { %4475 = vmatmul.f32.gmra.mxu0 %v6032_v38  ;;  %4562 = vmatmul.f32.gmra.mxu1 %v6038_v21  ;;  %v4323_v38 = vpop.f32.mrf.mxu3 }
 0x3a3   :  { %v4185_v26 = vpop.f32.mrf.mxu1 }
 0x3aa   :  { %4479 = vmatmul.f32.gmra.mxu0 %v6038_v21  ;;  %4566 = vmatmul.f32.gmra.mxu1 %v6043_v52  ;;  %v4329_v35 = vpop.f32.mrf.mxu3 }
 0x3ab   :  { %v4082_v6 = vpop.f32.mrf.mxu0  ;;  %v4189_v12 = vpop.f32.mrf.mxu1  ;;  %v4330_v43 = vadd.f32 %v4329_v35, %v4229_v45  ;;  %v4154_v35 = vadd.f32 %v6084_v25, %v6086_v48 }
 0x3ac   :  { %v6130_v41 = vadd.f32 %v4185_v26, %v4082_v6 }
 0x3b2   :  { %4483 = vmatmul.f32.gmra.mxu0 %v6043_v52  ;;  %4570 = vmatmul.f32.gmra.mxu1 %v6048_v54  ;;  %v4335_v11 = vpop.f32.mrf.mxu3 }
 0x3b3   :  { %v4090_v42 = vpop.f32.mrf.mxu0  ;;  %v4336_v28 = vadd.f32 %v4335_v11, %v4234_v40 }
 0x3b4   :  { %v6134_v50 = vadd.f32 %v4189_v12, %v4090_v42  ;;  %v4239_v42 = vadd.f32 %v4238_v37, %v4150_v49 }
 0x3ba   :  { %4487 = vmatmul.f32.gmra.mxu0 %v6048_v54  ;;  %4574 = vmatmul.f32.gmra.mxu1 %v6053_v17  ;;  %v4341_v22 = vpop.f32.mrf.mxu3 }
 0x3bb   :  { %v4342_v13 = vadd.f32 %v4341_v22, %v4239_v42 }
 0x3bf   :  { %v4193_v21 = vpop.f32.mrf.mxu1 }
 0x3c2   :  { %4491 = vmatmul.f32.gmra.mxu0 %v6053_v17  ;;  %4578 = vmatmul.f32.gmra.mxu1 %v6066_v32  ;;  %v4224_v17 = vadd.f32 %v4223_v39, %v4138_v23  ;;  %v4347_v1 = vpop.f32.mrf.mxu3  ;;  %v4655_v39 = vld [vmem:[#allocation2 + $0x10] sm:$0xff] }
 0x3c4   :  { %v4324_v46 = vadd.f32 %v4323_v38, %v4224_v17 }
 0x3c7   :  { %v4098_v52 = vpop.f32.mrf.mxu0  ;;  %v4197_v7 = vpop.f32.mrf.mxu1 }
 0x3c8   :  { %v6140_v60 = vadd.f32 %v4193_v21, %v4098_v52 }
 0x3ca   :  { %4495 = vmatmul.f32.gmra.mxu0 %v6066_v32  ;;  %4582 = vmatmul.f32.gmra.mxu1 %v6075_v62  ;;  %v4353_v6 = vpop.f32.mrf.mxu3 }
 0x3cf   :  { %v4106_v54 = vpop.f32.mrf.mxu0  ;;  %v4523_v36 = vpop.f32.mrf.mxu1 }
 0x3d0   :  { %v6144_v14 = vadd.f32 %v4197_v7, %v4106_v54 }
 0x3d2   :  { %4499 = vmatmul.f32.gmra.mxu0 %v6075_v62  ;;  %v4243_v62 = vpop.f32.mrf.mxu2  ;;  %v4359_v11 = vpop.f32.mrf.mxu3 }
 0x3d3   :  { %v4244_v7 = vadd.f32 %v4243_v62, %v4154_v35 }
 0x3d5   :  { %v4348_v54 = vadd.f32 %v4347_v1, %v4244_v7 }
 0x3d7   :  { %v4440_v31 = vpop.f32.mrf.mxu0  ;;  %v4527_v4 = vpop.f32.mrf.mxu1 }
 0x3d8   :  { %v4441_v32 = vadd.f32 %v4440_v31, %v4324_v46  ;;  %v4158_v46 = vadd.f32 %v6090_v16, %v6092_v59  ;;  %v4657_v31 = vld [vmem:[#allocation2 + $0x20] sm:$0xff] }
 0x3da   :  { %v4524_v5 = vadd.f32 %v4523_v36, %v4441_v32  ;;  %v4248_v26 = vpop.f32.mrf.mxu2  ;;  %v4365_v32 = vpop.f32.mrf.mxu3 }
 0x3db   :  { %v4249_v22 = vadd.f32 %v4248_v26, %v4158_v46 }
 0x3dc   :  { %v4586_v34 = vadd.f32 %v4653_v61, %v4524_v5  ;;  %v4162_v61 = vadd.f32 %v6096_v47, %v6098_v9 }
 0x3dd   :  { %v4354_v25 = vadd.f32 %v4353_v6, %v4249_v22 }
 0x3de   :  { %4602 = vst.msk [vmem:[#allocation13] sm:$0xff] %vm144_vm0, %v4586_v34 }
 0x3df   :  { %v4444_v57 = vpop.f32.mrf.mxu0  ;;  %v4531_v3 = vpop.f32.mrf.mxu1 }
 0x3e0   :  { %v4445_v27 = vadd.f32 %v4444_v57, %v4330_v43  ;;  %v4658_v57 = vld [vmem:[#allocation2 + $0x28] sm:$0xff] }
 0x3e2   :  { %v4528_v0 = vadd.f32 %v4527_v4, %v4445_v27  ;;  %v4253_v55 = vpop.f32.mrf.mxu2  ;;  %v4371_v33 = vpop.f32.mrf.mxu3 }
 0x3e3   :  { %v4254_v43 = vadd.f32 %v4253_v55, %v4162_v61 }
 0x3e4   :  { %v4587_v30 = vadd.f32 %v4654_v24, %v4528_v0  ;;  %v4166_v0 = vadd.f32 %v6102_v44, %v6106_v10 }
 0x3e5   :  { %v4360_v16 = vadd.f32 %v4359_v11, %v4254_v43 }
 0x3e6   :  { %4603 = vst.msk [vmem:[#allocation13 + $0x8] sm:$0xff] %vm144_vm0, %v4587_v30  ;;  %v4659_v30 = vld [vmem:[#allocation2 + $0x30] sm:$0xff] }
 0x3e7   :  { %v4448_v56 = vpop.f32.mrf.mxu0  ;;  %v4535_v58 = vpop.f32.mrf.mxu1 }
 0x3e8   :  { %v4449_v51 = vadd.f32 %v4448_v56, %v4336_v28 }
 0x3ea   :  { %v4532_v12 = vadd.f32 %v4531_v3, %v4449_v51  ;;  %v4258_v48 = vpop.f32.mrf.mxu2  ;;  %v4377_v26 = vpop.f32.mrf.mxu3 }
 0x3eb   :  { %v4259_v24 = vadd.f32 %v4258_v48, %v4166_v0  ;;  %v4665_v0 = vld [vmem:[#allocation2 + $0x60] sm:$0xff] }
 0x3ec   :  { %v4588_v38 = vadd.f32 %v4655_v39, %v4532_v12  ;;  %v4660_v12 = vld [vmem:[#allocation2 + $0x38] sm:$0xff] }
 0x3ed   :  { %v4366_v47 = vadd.f32 %v4365_v32, %v4259_v24 }
 0x3ee   :  { %4604 = vst.msk [vmem:[#allocation13 + $0x10] sm:$0xff] %vm144_vm0, %v4588_v38 }
 0x3ef   :  { %v4452_v53 = vpop.f32.mrf.mxu0  ;;  %v4539_v21 = vpop.f32.mrf.mxu1 }
 0x3f0   :  { %v4453_v29 = vadd.f32 %v4452_v53, %v4342_v13 }
 0x3f2   :  { %v4536_v52 = vadd.f32 %v4535_v58, %v4453_v29  ;;  %v4263_v27 = vpop.f32.mrf.mxu2  ;;  %v4661_v29 = vld [vmem:[#allocation2 + $0x40] sm:$0xff] }
 0x3f3   :  { %v4264_v6 = vadd.f32 %v4263_v27, %v6110_v18 }
 0x3f4   :  { %v4589_v20 = vadd.f32 %v4656_v2, %v4536_v52  ;;  %v4383_v52 = vpop.f32.mrf.mxu3 }
 0x3f5   :  { %v4372_v39 = vadd.f32 %v4371_v33, %v4264_v6 }
 0x3f6   :  { %4605 = vst.msk [vmem:[#allocation13 + $0x18] sm:$0xff] %vm144_vm0, %v4589_v20 }
 0x3f7   :  { %v4456_v36 = vpop.f32.mrf.mxu0  ;;  %v4543_v23 = vpop.f32.mrf.mxu1 }
 0x3f8   :  { %v4457_v17 = vadd.f32 %v4456_v36, %v4348_v54  ;;  %v4662_v54 = vld [vmem:[#allocation2 + $0x48] sm:$0xff] }
 0x3fa   :  { %v4540_v37 = vadd.f32 %v4539_v21, %v4457_v17  ;;  %v4268_v49 = vpop.f32.mrf.mxu2 }
 0x3fb   :  { %v4269_v21 = vadd.f32 %v4268_v49, %v6114_v15 }
 0x3fc   :  { %v4590_v4 = vadd.f32 %v4657_v31, %v4540_v37  ;;  %v4389_v46 = vpop.f32.mrf.mxu3 }
 0x3fd   :  { %v4378_v7 = vadd.f32 %v4377_v26, %v4269_v21 }
 0x3fe   :  { %4606 = vst.msk [vmem:[#allocation13 + $0x20] sm:$0xff] %vm144_vm0, %v4590_v4 }
 0x3ff   :  { %v4460_v8 = vpop.f32.mrf.mxu0  ;;  %v4547_v5 = vpop.f32.mrf.mxu1 }
 0x400   :  { %v4461_v45 = vadd.f32 %v4460_v8, %v4354_v25  ;;  %v4663_v25 = vld [vmem:[#allocation2 + $0x50] sm:$0xff] }
 0x402   :  { %v4544_v34 = vadd.f32 %v4543_v23, %v4461_v45  ;;  %v4273_v53 = vpop.f32.mrf.mxu2 }
 0x403   :  { %v4274_v2 = vadd.f32 %v4273_v53, %v6120_v63 }
 0x404   :  { %v4591_v3 = vadd.f32 %v4658_v57, %v4544_v34  ;;  %v4395_v45 = vpop.f32.mrf.mxu3  ;;  %v4664_v57 = vld [vmem:[#allocation2 + $0x58] sm:$0xff] }
 0x405   :  { %v4384_v17 = vadd.f32 %v4383_v52, %v4274_v2  ;;  %v4668_v52 = vld [vmem:[#allocation2 + $0x78] sm:$0xff] }
 0x406   :  { %4607 = vst.msk [vmem:[#allocation13 + $0x28] sm:$0xff] %vm144_vm0, %v4591_v3 }
 0x407   :  { %v4464_v59 = vpop.f32.mrf.mxu0  ;;  %v4551_v62 = vpop.f32.mrf.mxu1 }
 0x408   :  { %v4465_v1 = vadd.f32 %v4464_v59, %v4360_v16 }
 0x40a   :  { %v4548_v40 = vadd.f32 %v4547_v5, %v4465_v1  ;;  %v4278_v23 = vpop.f32.mrf.mxu2 }
 0x40b   :  { %v4279_v31 = vadd.f32 %v4278_v23, %v6124_v19 }
 0x40c   :  { %v4592_v28 = vadd.f32 %v4659_v30, %v4548_v40  ;;  %v4401_v33 = vpop.f32.mrf.mxu3 }
 0x40d   :  { %v4390_v8 = vadd.f32 %v4389_v46, %v4279_v31 }
 0x40e   :  { %4608 = vst.msk [vmem:[#allocation13 + $0x30] sm:$0xff] %vm144_vm0, %v4592_v28 }
 0x40f   :  { %v4468_v9 = vpop.f32.mrf.mxu0  ;;  %v4555_v56 = vpop.f32.mrf.mxu1 }
 0x410   :  { %v4469_v58 = vadd.f32 %v4468_v9, %v4366_v47 }
 0x412   :  { %v4552_v51 = vadd.f32 %v4551_v62, %v4469_v58  ;;  %v4283_v32 = vpop.f32.mrf.mxu2 }
 0x413   :  { %v4284_v61 = vadd.f32 %v4283_v32, %v6130_v41 }
 0x414   :  { %v4593_v42 = vadd.f32 %v4660_v12, %v4552_v51  ;;  %v4407_v58 = vpop.f32.mrf.mxu3  ;;  %v4666_v51 = vld [vmem:[#allocation2 + $0x68] sm:$0xff] }
 0x415   :  { %v4396_v16 = vadd.f32 %v4395_v45, %v4284_v61 }
 0x416   :  { %4609 = vst.msk [vmem:[#allocation13 + $0x38] sm:$0xff] %vm144_vm0, %v4593_v42 }
 0x417   :  { %v4472_v44 = vpop.f32.mrf.mxu0  ;;  %v4559_v10 = vpop.f32.mrf.mxu1 }
 0x418   :  { %v4473_v38 = vadd.f32 %v4472_v44, %v4372_v39 }
 0x41a   :  { %v4556_v13 = vadd.f32 %v4555_v56, %v4473_v38  ;;  %v4288_v19 = vpop.f32.mrf.mxu2 }
 0x41b   :  { %v4289_v1 = vadd.f32 %v4288_v19, %v6134_v50 }
 0x41c   :  { %v4594_v35 = vadd.f32 %v4661_v29, %v4556_v13  ;;  %v4413_v13 = vpop.f32.mrf.mxu3 }
 0x41d   :  { %v4402_v30 = vadd.f32 %v4401_v33, %v4289_v1 }
 0x41e   :  { %4610 = vst.msk [vmem:[#allocation13 + $0x40] sm:$0xff] %vm144_vm0, %v4594_v35 }
 0x41f   :  { %v4476_v55 = vpop.f32.mrf.mxu0  ;;  %v4563_v18 = vpop.f32.mrf.mxu1 }
 0x420   :  { %v4477_v11 = vadd.f32 %v4476_v55, %v4378_v7 }
 0x422   :  { %v4560_v20 = vadd.f32 %v4559_v10, %v4477_v11  ;;  %v4293_v41 = vpop.f32.mrf.mxu2  ;;  %v4667_v10 = vld [vmem:[#allocation2 + $0x70] sm:$0xff] }
 0x423   :  { %v4294_v9 = vadd.f32 %v4293_v41, %v6140_v60 }
 0x424   :  { %v4595_v36 = vadd.f32 %v4662_v54, %v4560_v20 }
 0x425   :  { %v4408_v26 = vadd.f32 %v4407_v58, %v4294_v9 }
 0x426   :  { %4611 = vst.msk [vmem:[#allocation13 + $0x48] sm:$0xff] %vm144_vm0, %v4595_v36 }
 0x427   :  { %v4480_v15 = vpop.f32.mrf.mxu0  ;;  %v4567_v22 = vpop.f32.mrf.mxu1 }
 0x428   :  { %v4481_v37 = vadd.f32 %v4480_v15, %v4384_v17 }
 0x42a   :  { %v4564_v4 = vadd.f32 %v4563_v18, %v4481_v37  ;;  %v4298_v42 = vpop.f32.mrf.mxu2 }
 0x42b   :  { %v4299_v39 = vadd.f32 %v4298_v42, %v6144_v14 }
 0x42c   :  { %v4596_v48 = vadd.f32 %v4663_v25, %v4564_v4 }
 0x42d   :  { %v4414_v53 = vadd.f32 %v4413_v13, %v4299_v39 }
 0x42e   :  { %4612 = vst.msk [vmem:[#allocation13 + $0x50] sm:$0xff] %vm144_vm0, %v4596_v48 }
 0x42f   :  { %v4484_v63 = vpop.f32.mrf.mxu0  ;;  %v4571_v43 = vpop.f32.mrf.mxu1 }
 0x430   :  { %v4485_v5 = vadd.f32 %v4484_v63, %v4390_v8 }
 0x432   :  { %v4568_v34 = vadd.f32 %v4567_v22, %v4485_v5 }
 0x434   :  { %v4597_v3 = vadd.f32 %v4664_v57, %v4568_v34 }
 0x436   :  { %4613 = vst.msk [vmem:[#allocation13 + $0x58] sm:$0xff] %vm144_vm0, %v4597_v3 }
 0x437   :  { %v4488_v59 = vpop.f32.mrf.mxu0  ;;  %v4575_v24 = vpop.f32.mrf.mxu1 }
 0x438   :  { %v4489_v62 = vadd.f32 %v4488_v59, %v4396_v16 }
 0x43a   :  { %v4572_v27 = vadd.f32 %v4571_v43, %v4489_v62 }
 0x43c   :  { %v4598_v40 = vadd.f32 %v4665_v0, %v4572_v27 }
 0x43e   :  { %4614 = vst.msk [vmem:[#allocation13 + $0x60] sm:$0xff] %vm144_vm0, %v4598_v40 }
 0x43f   :  { %v4492_v28 = vpop.f32.mrf.mxu0  ;;  %v4579_v50 = vpop.f32.mrf.mxu1 }
 0x440   :  { %v4493_v47 = vadd.f32 %v4492_v28, %v4402_v30 }
 0x442   :  { %v4576_v56 = vadd.f32 %v4575_v24, %v4493_v47 }
 0x444   :  { %v4599_v49 = vadd.f32 %v4666_v51, %v4576_v56 }
 0x446   :  { %4615 = vst.msk [vmem:[#allocation13 + $0x68] sm:$0xff] %vm144_vm0, %v4599_v49 }
 0x447   :  { %v4496_v6 = vpop.f32.mrf.mxu0  ;;  %v4583_v29 = vpop.f32.mrf.mxu1 }
 0x448   :  { %v4497_v12 = vadd.f32 %v4496_v6, %v4408_v26 }
 0x44a   :  { %v4580_v44 = vadd.f32 %v4579_v50, %v4497_v12 }
 0x44c   :  { %v4600_v38 = vadd.f32 %v4667_v10, %v4580_v44 }
 0x44e   :  { %4616 = vst.msk [vmem:[#allocation13 + $0x70] sm:$0xff] %vm144_vm0, %v4600_v38 }
 0x44f   :  { %v4500_v60 = vpop.f32.mrf.mxu0 }
 0x450   :  { %v4501_v21 = vadd.f32 %v4500_v60, %v4414_v53 }
 0x452   :  { %v4584_v35 = vadd.f32 %v4583_v29, %v4501_v21 }
 0x454   :  { %v4601_v7 = vadd.f32 %v4668_v52, %v4584_v35 }
 0x456   :  { %4617 = vst.msk [vmem:[#allocation13 + $0x78] sm:$0xff] %vm144_vm0, %v4601_v7 }
 0x457   :  { %4630 = dma.vmem_to_hbm [thread:$0]  %s4623_s24, 2048, %s4625_s27, [#allocation4], %s4848_s29, %s4848_s29, %s4849_s30  }
 0x458   :  { %4845 = dma.done.wait [#allocation4], 2048  }
 0x459   :  { %4846 = vsyncadd [#allocation4], 4294965248 }
 0x45a   :  { %4635 = vsyncpa [#allocation3], 1 }
 0x45b   :  { %4636 = vsyncpa [#allocation6], 1 }
 0x45c   :  { %4637 = vsyncpa [#allocation9], 1 }
 0x45d   :  { %4638 = vsyncpa [#allocation12], 1 }
 0x45e   :  { %4639 = vsyncpa [#allocation4], 1 }

</bundles_post_ra>
